<compile_context>
chip_gen: v7x
topology: tpu7x:2x2x1
jax: 0.10.0
libtpu: 0.0.40
codegen_flags: <defaults>
</compile_context>

<pallas_src>
import functools

import jax
import jax.numpy as jnp
from jax.experimental import pallas as pl
from jax.experimental.pallas import tpu as pltpu


def _round_up(x, m):
    return (x + m - 1) // m * m


def _pick_tile_rows(h, target=8):
    """Largest divisor of h that is <= target (keeps >= 2 row tiles for h>target)."""
    best = 1
    for t in range(1, h + 1):
        if h % t == 0 and t <= target:
            best = t
    return best


# ---------------------------------------------------------------------------
# Fused Depth_Wise block kernel: expand(1x1) -> depthwise(kxk) -> project(1x1)
# + residual add, over one (batch, row-tile) grid cell.
# ---------------------------------------------------------------------------
def _fused_block_kernel(xt_ref, xm_ref, xb_ref, w1_ref, w2_ref, sg_ref,
                        w3_ref, b3_ref, o_ref, h1w_ref,
                        *, tr, ph, pw, kh, kw, h_img):
    wimg = xm_ref.shape[1]
    cp = xm_ref.shape[2]
    gp = w1_ref.shape[1]
    r = tr + 2 * ph
    i = pl.program_id(1)

    sg = sg_ref[...]                                  # (4, gp): b1, a1, b2, a2

    # ---- 1x1 expand + BN + PReLU on the tr rows plus the (kh-1)-row halo ----
    x_rows = jnp.concatenate([xt_ref[...], xm_ref[...], xb_ref[...]], axis=0)
    h1 = jnp.dot(x_rows.reshape(r * wimg, cp), w1_ref[...],
                 preferred_element_type=jnp.float32)  # bf16 MXU feed, f32 acc
    h1 = h1 + sg[0:1, :]
    h1 = jnp.where(h1 >= 0.0, h1, sg[1:2, :] * h1)
    h1 = h1.reshape(r, wimg, gp)

    # Rows outside the image carry the depthwise conv's zero padding; the pad
    # is applied AFTER the expand conv, so it zeroes h1 (not x).  This also
    # neutralises the clamped halo reads at the top/bottom borders.
    row = jax.lax.broadcasted_iota(jnp.int32, (r, 1, 1), 0) + (i * tr - ph)
    h1 = jnp.where((row >= 0) & (row < h_img), h1, 0.0)

    # ---- depthwise kxk + BN + PReLU -----------------------------------------
    # Stage h1 into a W-zero-padded VMEM scratch once; the pad columns are
    # re-zeroed every step because the scratch persists across grid steps.
    zpad = jnp.zeros((r, pw, gp), jnp.float32)
    h1w_ref[:, 0:pw, :] = zpad
    h1w_ref[:, pw + wimg:pw + wimg + pw, :] = zpad
    h1w_ref[:, pw:pw + wimg, :] = h1

    acc = jnp.broadcast_to(sg[2:3, :].reshape(1, 1, gp), (tr, wimg, gp))
    for dj in range(kw):                              # column shift hoisted out
        cols = h1w_ref[:, dj:dj + wimg, :]            # (r, wimg, gp) f32
        for di in range(kh):                          # row shift = free slice
            wt = w2_ref[di * kw + dj:di * kw + dj + 1, :].reshape(1, 1, gp)
            acc = acc + cols[di:di + tr] * wt
    h2 = jnp.where(acc >= 0.0, acc, sg[3:4, :] * acc)

    # ---- 1x1 project + BN bias + residual add (f32 epilogue, bf16 store) ----
    p = jnp.dot(h2.reshape(tr * wimg, gp).astype(jnp.bfloat16), w3_ref[...],
                preferred_element_type=jnp.float32)
    p = p + b3_ref[...]
    p = p.reshape(tr, wimg, cp) + xm_ref[...].astype(jnp.float32)
    o_ref[...] = p.astype(o_ref.dtype)


def _depth_wise_block(x, blk, *, kh, kw, ph, pw, tr):
    """One residual Depth_Wise block on the bf16 NHWC channel-padded stream."""
    n, h, w, cp = x.shape
    gp = blk["w1"].shape[1]
    assert ph >= 1 and pw >= 1
    assert h % tr == 0 and tr % ph == 0 and h % ph == 0
    nt = h // tr
    bph = tr // ph                 # ph-sized blocks per row tile
    last = h // ph - 1             # last valid ph-block index
    r = tr + 2 * ph

    kernel = functools.partial(_fused_block_kernel, tr=tr, ph=ph, pw=pw,
                               kh=kh, kw=kw, h_img=h)

    flops = n * h * w * (2 * cp * gp + 2 * gp * kh * kw + 2 * gp * cp)
    bytes_accessed = int(
        x.size * 2 * (2 + 2 * ph / tr)                     # stream read(+halo)+write, bf16
        + (blk["w1"].size + blk["w3"].size) * 2
        + (blk["w2"].size + blk["sg"].size + blk["b3"].size) * 4)

    return pl.pallas_call(
        kernel,
        out_shape=jax.ShapeDtypeStruct((n, h, w, cp), jnp.bfloat16),
        grid_spec=pltpu.PrefetchScalarGridSpec(
            num_scalar_prefetch=0,
            grid=(n, nt),
            in_specs=[
                # ph-row halo above the tile (clamped at the top border)
                pl.BlockSpec((None, ph, w, cp),
                             lambda b, i: (b, jnp.maximum(i * bph - 1, 0), 0, 0)),
                # the tr output rows themselves (also the residual shortcut)
                pl.BlockSpec((None, tr, w, cp), lambda b, i: (b, i, 0, 0)),
                # ph-row halo below the tile (clamped at the bottom border)
                pl.BlockSpec((None, ph, w, cp),
                             lambda b, i: (b, jnp.minimum((i + 1) * bph, last), 0, 0)),
                pl.BlockSpec((cp, gp), lambda b, i: (0, 0)),        # w1  (bf16)
                pl.BlockSpec((kh * kw, gp), lambda b, i: (0, 0)),   # w2  (f32)
                pl.BlockSpec((4, gp), lambda b, i: (0, 0)),         # b1,a1,b2,a2
                pl.BlockSpec((gp, cp), lambda b, i: (0, 0)),        # w3  (bf16)
                pl.BlockSpec((1, cp), lambda b, i: (0, 0)),         # b3
            ],
            out_specs=pl.BlockSpec((None, tr, w, cp), lambda b, i: (b, i, 0, 0)),
            scratch_shapes=[pltpu.VMEM((r, w + 2 * pw, gp), jnp.float32)],
        ),
        compiler_params=pltpu.CompilerParams(
            dimension_semantics=("parallel", "parallel")),
        cost_estimate=pl.CostEstimate(flops=flops, transcendentals=0,
                                      bytes_accessed=bytes_accessed),
    )(x, x, x, blk["w1"], blk["w2"], blk["sg"], blk["w3"], blk["b3"])


# ---------------------------------------------------------------------------
# Parameter folding (eval-mode BN) + channel padding to lane-dense multiples
# ---------------------------------------------------------------------------
def _fold_bn(gamma, beta, mean, var, eps):
    scale = gamma / jnp.sqrt(var + eps)
    bias = beta - mean * scale
    return scale, bias


def _prepare_block(rb, *, eps):
    g, c = rb["conv1_w"].shape[:2]
    kh, kw = rb["conv2_w"].shape[2:]
    cp = _round_up(c, 128)
    gp = _round_up(g, 128)

    # 1x1 expand: fold BN scale into the weight, cast bf16, pad channels.
    s1, b1 = _fold_bn(*rb["bn1"], eps)
    w1 = rb["conv1_w"].reshape(g, c).T * s1[None, :]                     # [c, g]
    w1p = jnp.zeros((cp, gp), jnp.bfloat16).at[:c, :g].set(w1.astype(jnp.bfloat16))

    # depthwise kxk: per-channel weights * BN scale, flattened taps (kh*kw, C).
    s2, b2 = _fold_bn(*rb["bn2"], eps)
    w2 = jnp.transpose(rb["conv2_w"].reshape(g, kh, kw), (1, 2, 0)) * s2[None, None, :]
    w2p = jnp.zeros((kh * kw, gp), jnp.float32).at[:, :g].set(w2.reshape(kh * kw, g))

    # 1x1 project (Linear_block, no PReLU): fold BN scale, bf16, pad.
    s3, b3 = _fold_bn(*rb["bn3"], eps)
    w3 = rb["conv3_w"].reshape(c, g).T * s3[None, :]                     # [g, c]
    w3p = jnp.zeros((gp, cp), jnp.bfloat16).at[:g, :c].set(w3.astype(jnp.bfloat16))

    sg = jnp.zeros((4, gp), jnp.float32)
    sg = sg.at[0, :g].set(b1).at[1, :g].set(rb["prelu1"])
    sg = sg.at[2, :g].set(b2).at[3, :g].set(rb["prelu2"])
    b3p = jnp.zeros((1, cp), jnp.float32).at[0, :c].set(b3)

    return dict(w1=w1p, w2=w2p, sg=sg, w3=w3p, b3=b3p)


def residual_forward(x_nchw, raw_blocks, *, kernel=(3, 3), stride=(1, 1),
                     padding=(1, 1), eps=1e-5, tile_rows=None):
    """Forward of MobileFaceNet Residual(c, num_block, groups) — eval-mode BN."""
    assert stride == (1, 1), "Residual uses stride=(1,1)"
    kh, kw = kernel
    ph, pw = padding
    assert kh == 2 * ph + 1 and kw == 2 * pw + 1, "residual needs 'same' conv"

    n, c, h, w = x_nchw.shape
    cp = _round_up(c, 128)
    tr = tile_rows if tile_rows is not None else _pick_tile_rows(h)

    # NCHW -> NHWC once; pad channels to a lane-dense multiple of 128 once;
    # the residual/activation stream stays bf16 end-to-end.
    x = jnp.transpose(x_nchw, (0, 2, 3, 1))
    x = jnp.pad(x, ((0, 0), (0, 0), (0, 0), (0, cp - c))).astype(jnp.bfloat16)

    for rb in raw_blocks:
        assert tuple(rb["conv2_w"].shape[2:]) == tuple(kernel)
        blk = _prepare_block(rb, eps=eps)
        x = _depth_wise_block(x, blk, kh=kh, kw=kw, ph=ph, pw=pw, tr=tr)

    x = x[..., :c].astype(jnp.float32)
    return jnp.transpose(x, (0, 3, 1, 2))                 # back to NCHW, f32


# ---------------------------------------------------------------------------
# Deterministic parameter construction + pure-JAX reference
# ---------------------------------------------------------------------------
def init_residual_params(key, c, num_block, groups, kernel=(3, 3)):
    kh, kw = kernel

    def bn_params(size, shift):
        ch = jnp.arange(size, dtype=jnp.float32)
        gamma = 1.0 + 0.05 * jnp.cos(0.3 * ch + shift)
        beta = 0.02 * jnp.sin(0.2 * ch + shift)
        mean = 0.01 * jnp.cos(0.1 * ch + shift)
        var = 1.0 + 0.1 * (0.5 + 0.5 * jnp.sin(0.25 * ch + shift))
        return gamma, beta, mean, var

    blocks = []
    block_keys = jax.random.split(key, num_block)
    for b in range(num_block):
        k1, k2, k3 = jax.random.split(block_keys[b], 3)
        gch = jnp.arange(groups, dtype=jnp.float32)
        blocks.append(dict(
            conv1_w=0.1 * jax.random.normal(k1, (groups, c, 1, 1), jnp.float32),
            bn1=bn_params(groups, 0.1 + b),
            prelu1=0.25 + 0.01 * gch,
            conv2_w=0.1 * jax.random.normal(k2, (groups, 1, kh, kw), jnp.float32),
            bn2=bn_params(groups, 0.2 + b),
            prelu2=0.25 - 0.005 * gch,
            conv3_w=0.1 * jax.random.normal(k3, (c, groups, 1, 1), jnp.float32),
            bn3=bn_params(c, 0.3 + b),
        ))
    return blocks


def _ref_conv_bn(x, w, bn, stride, padding, groups, eps):
    y = jax.lax.conv_general_dilated(
        x, w, window_strides=stride,
        padding=[(padding[0], padding[0]), (padding[1], padding[1])],
        dimension_numbers=("NCHW", "OIHW", "NCHW"),
        feature_group_count=groups)
    gamma, beta, mean, var = bn
    scale = gamma / jnp.sqrt(var + eps)
    bias = beta - mean * scale
    return y * scale[None, :, None, None] + bias[None, :, None, None]


def _ref_prelu(y, alpha):
    return jnp.where(y >= 0, y, alpha[None, :, None, None] * y)


def residual_reference(x, raw_blocks, *, kernel=(3, 3), stride=(1, 1),
                       padding=(1, 1), eps=1e-5):
    for rb in raw_blocks:
        g = rb["conv1_w"].shape[0]
        sc = x
        t = _ref_prelu(_ref_conv_bn(x, rb["conv1_w"], rb["bn1"],
                                    (1, 1), (0, 0), 1, eps), rb["prelu1"])
        t = _ref_prelu(_ref_conv_bn(t, rb["conv2_w"], rb["bn2"],
                                    stride, padding, g, eps), rb["prelu2"])
        t = _ref_conv_bn(t, rb["conv3_w"], rb["bn3"], (1, 1), (0, 0), 1, eps)
        x = sc + t
    return x


if __name__ == "__main__":
    key = jax.random.PRNGKey(0)
    kx, kp = jax.random.split(key)

    # Small shapes consistent with a (tiny) MobileFaceNet Residual stage.
    N, C, H, W = 2, 8, 16, 16
    GROUPS = 16
    NUM_BLOCK = 2
    KERNEL = (3, 3)
    STRIDE = (1, 1)
    PADDING = (1, 1)

    x = jax.random.normal(kx, (N, C, H, W), dtype=jnp.float32)
    raw_blocks = init_residual_params(kp, C, NUM_BLOCK, GROUPS, KERNEL)

    fwd = jax.jit(functools.partial(residual_forward, kernel=KERNEL,
                                    stride=STRIDE, padding=PADDING))
    out = jax.block_until_ready(fwd(x, raw_blocks))

    ref = residual_reference(x, raw_blocks, kernel=KERNEL, stride=STRIDE,
                             padding=PADDING)
    assert out.shape == ref.shape == (N, C, H, W)
    max_err = float(jnp.max(jnp.abs(out - ref)))
    assert jnp.allclose(out, ref, atol=2e-2, rtol=2e-2), f"mismatch {max_err}"

    print("KERNEL_OK")
</pallas_src>

<mosaic_0001>
module attributes {stable_mosaic.version = 11 : i64} {
  func.func @_fused_block_kernel(%arg0: i32, %arg1: i32, %arg2: memref<1x1x16x128xbf16, #tpu.memory_space<vmem>>, %arg3: memref<1x8x16x128xbf16, #tpu.memory_space<vmem>>, %arg4: memref<1x1x16x128xbf16, #tpu.memory_space<vmem>>, %arg5: memref<128x128xbf16, #tpu.memory_space<vmem>>, %arg6: memref<9x128xf32, #tpu.memory_space<vmem>>, %arg7: memref<4x128xf32, #tpu.memory_space<vmem>>, %arg8: memref<128x128xbf16, #tpu.memory_space<vmem>>, %arg9: memref<1x128xf32, #tpu.memory_space<vmem>>, %arg10: memref<1x8x16x128xbf16, #tpu.memory_space<vmem>>, %arg11: memref<10x18x128xf32, #tpu.memory_space<vmem>>) attributes {dimension_semantics = [#tpu.dimension_semantics<parallel>, #tpu.dimension_semantics<parallel>], iteration_bounds = array<i64: 2, 2>, scalar_prefetch = 0 : i64, scratch_operands = 1 : i64, tpu.core_type = #tpu.core_type<tc>, window_params = [{transform_indices = @transform_0, window_bounds = array<i64: 1, 1, 16, 128>}, {transform_indices = @transform_1, window_bounds = array<i64: 1, 8, 16, 128>}, {transform_indices = @transform_2, window_bounds = array<i64: 1, 1, 16, 128>}, {pipeline_mode = #tpu.pipeline_mode<synchronous>, transform_indices = @transform_3, window_bounds = array<i64: 128, 128>}, {pipeline_mode = #tpu.pipeline_mode<synchronous>, transform_indices = @transform_4, window_bounds = array<i64: 9, 128>}, {pipeline_mode = #tpu.pipeline_mode<synchronous>, transform_indices = @transform_5, window_bounds = array<i64: 4, 128>}, {pipeline_mode = #tpu.pipeline_mode<synchronous>, transform_indices = @transform_6, window_bounds = array<i64: 128, 128>}, {pipeline_mode = #tpu.pipeline_mode<synchronous>, transform_indices = @transform_7, window_bounds = array<i64: 1, 128>}, {transform_indices = @transform_8, window_bounds = array<i64: 1, 8, 16, 128>}]} {
    %c0 = arith.constant 0 : index
    %c0_0 = arith.constant 0 : index
    %0 = vector.load %arg7[%c0, %c0_0] : memref<4x128xf32, #tpu.memory_space<vmem>>, vector<4x128xf32>
    %c0_1 = arith.constant 0 : index
    %c0_2 = arith.constant 0 : index
    %c0_3 = arith.constant 0 : index
    %c0_4 = arith.constant 0 : index
    %1 = vector.load %arg2[%c0_1, %c0_2, %c0_3, %c0_4] : memref<1x1x16x128xbf16, #tpu.memory_space<vmem>>, vector<1x1x16x128xbf16>
    %2 = vector.shape_cast %1 : vector<1x1x16x128xbf16> to vector<1x16x128xbf16>
    %c0_5 = arith.constant 0 : index
    %c0_6 = arith.constant 0 : index
    %c0_7 = arith.constant 0 : index
    %c0_8 = arith.constant 0 : index
    %3 = vector.load %arg3[%c0_5, %c0_6, %c0_7, %c0_8] : memref<1x8x16x128xbf16, #tpu.memory_space<vmem>>, vector<1x8x16x128xbf16>
    %4 = vector.shape_cast %3 : vector<1x8x16x128xbf16> to vector<8x16x128xbf16>
    %c0_9 = arith.constant 0 : index
    %c0_10 = arith.constant 0 : index
    %c0_11 = arith.constant 0 : index
    %c0_12 = arith.constant 0 : index
    %5 = vector.load %arg4[%c0_9, %c0_10, %c0_11, %c0_12] : memref<1x1x16x128xbf16, #tpu.memory_space<vmem>>, vector<1x1x16x128xbf16>
    %6 = vector.shape_cast %5 : vector<1x1x16x128xbf16> to vector<1x16x128xbf16>
    %7 = tpu.concatenate %2, %4, %6 in 0 : vector<1x16x128xbf16>, vector<8x16x128xbf16>, vector<1x16x128xbf16> -> vector<10x16x128xbf16>
    %8 = vector.shape_cast %7 : vector<10x16x128xbf16> to vector<160x128xbf16>
    %c0_13 = arith.constant 0 : index
    %c0_14 = arith.constant 0 : index
    %9 = vector.load %arg5[%c0_13, %c0_14] : memref<128x128xbf16, #tpu.memory_space<vmem>>, vector<128x128xbf16>
    %cst = arith.constant dense<0.000000e+00> : vector<160x128xf32>
    %10 = tpu.matmul %8, %9, %cst {dimension_numbers = #tpu.dot_dimension_numbers<[1], [0], [0], [1], [0, 0, 1, 1], [], []>} : vector<160x128xbf16>, vector<128x128xbf16>, vector<160x128xf32> -> vector<160x128xf32>
    %11 = vector.extract_strided_slice %0 {offsets = [0, 0], sizes = [1, 128], strides = [1, 1]} : vector<4x128xf32> to vector<1x128xf32>
    %12 = vector.broadcast %11 : vector<1x128xf32> to vector<160x128xf32>
    %13 = arith.addf %10, %12 : vector<160x128xf32>
    %cst_15 = arith.constant 0.000000e+00 : f32
    %14 = vector.broadcast %cst_15 : f32 to vector<160x128xf32>
    %15 = arith.cmpf oge, %13, %14 : vector<160x128xf32>
    %16 = vector.extract_strided_slice %0 {offsets = [1, 0], sizes = [1, 128], strides = [1, 1]} : vector<4x128xf32> to vector<1x128xf32>
    %17 = vector.broadcast %16 : vector<1x128xf32> to vector<160x128xf32>
    %18 = arith.mulf %17, %13 : vector<160x128xf32>
    %19 = arith.select %15, %13, %18 : vector<160x128xi1>, vector<160x128xf32>
    %20 = vector.shape_cast %19 : vector<160x128xf32> to vector<10x16x128xf32>
    %21 = tpu.iota {dimensions = array<i32: 0>} : vector<10x1x1xi32>
    %c8_i32 = arith.constant 8 : i32
    %22 = arith.muli %arg1, %c8_i32 : i32
    %c1_i32 = arith.constant 1 : i32
    %23 = arith.subi %22, %c1_i32 : i32
    %24 = vector.broadcast %23 : i32 to vector<10x1x1xi32>
    %25 = arith.addi %21, %24 : vector<10x1x1xi32>
    %c0_i32 = arith.constant 0 : i32
    %26 = vector.broadcast %c0_i32 : i32 to vector<10x1x1xi32>
    %27 = arith.cmpi sge, %25, %26 : vector<10x1x1xi32>
    %c16_i32 = arith.constant 16 : i32
    %28 = vector.broadcast %c16_i32 : i32 to vector<10x1x1xi32>
    %29 = arith.cmpi slt, %25, %28 : vector<10x1x1xi32>
    %30 = arith.andi %27, %29 : vector<10x1x1xi1>
    %cst_16 = arith.constant 0.000000e+00 : f32
    %31 = vector.shape_cast %30 : vector<10x1x1xi1> to vector<10x1x1xi1>
    %32 = vector.broadcast %31 : vector<10x1x1xi1> to vector<10x16x128xi1>
    %33 = vector.broadcast %cst_16 : f32 to vector<10x16x128xf32>
    %34 = arith.select %32, %20, %33 : vector<10x16x128xi1>, vector<10x16x128xf32>
    %cst_17 = arith.constant 0.000000e+00 : f32
    %35 = vector.broadcast %cst_17 : f32 to vector<10x1x128xf32>
    %c0_18 = arith.constant 0 : index
    %c0_19 = arith.constant 0 : index
    %c0_20 = arith.constant 0 : index
    %36 = vector.load %arg11[%c0_18, %c0_19, %c0_20] : memref<10x18x128xf32, #tpu.memory_space<vmem>>, vector<10x1x128xf32>
    tpu.vector_store %arg11[%c0_18, %c0_19, %c0_20], %35 {strides = array<i32>} : memref<10x18x128xf32, #tpu.memory_space<vmem>>, vector<10x1x128xf32>,
    %c0_21 = arith.constant 0 : index
    %c17 = arith.constant 17 : index
    %c0_22 = arith.constant 0 : index
    %37 = vector.load %arg11[%c0_21, %c17, %c0_22] : memref<10x18x128xf32, #tpu.memory_space<vmem>>, vector<10x1x128xf32>
    tpu.vector_store %arg11[%c0_21, %c17, %c0_22], %35 {strides = array<i32>} : memref<10x18x128xf32, #tpu.memory_space<vmem>>, vector<10x1x128xf32>,
    %c0_23 = arith.constant 0 : index
    %c1 = arith.constant 1 : index
    %c0_24 = arith.constant 0 : index
    %38 = vector.load %arg11[%c0_23, %c1, %c0_24] : memref<10x18x128xf32, #tpu.memory_space<vmem>>, vector<10x16x128xf32>
    tpu.vector_store %arg11[%c0_23, %c1, %c0_24], %34 {strides = array<i32>} : memref<10x18x128xf32, #tpu.memory_space<vmem>>, vector<10x16x128xf32>,
    %39 = vector.extract_strided_slice %0 {offsets = [2, 0], sizes = [1, 128], strides = [1, 1]} : vector<4x128xf32> to vector<1x128xf32>
    %40 = vector.shape_cast %39 : vector<1x128xf32> to vector<1x1x128xf32>
    %41 = vector.shape_cast %40 : vector<1x1x128xf32> to vector<1x1x128xf32>
    %42 = vector.broadcast %41 : vector<1x1x128xf32> to vector<8x16x128xf32>
    %c0_25 = arith.constant 0 : index
    %c0_26 = arith.constant 0 : index
    %c0_27 = arith.constant 0 : index
    %43 = vector.load %arg11[%c0_25, %c0_26, %c0_27] : memref<10x18x128xf32, #tpu.memory_space<vmem>>, vector<10x16x128xf32>
    %c0_28 = arith.constant 0 : index
    %c0_29 = arith.constant 0 : index
    %44 = vector.load %arg6[%c0_28, %c0_29] : memref<9x128xf32, #tpu.memory_space<vmem>>, vector<1x128xf32>
    %45 = vector.shape_cast %44 : vector<1x128xf32> to vector<1x1x128xf32>
    %46 = vector.extract_strided_slice %43 {offsets = [0, 0, 0], sizes = [8, 16, 128], strides = [1, 1, 1]} : vector<10x16x128xf32> to vector<8x16x128xf32>
    %47 = vector.broadcast %45 : vector<1x1x128xf32> to vector<8x16x128xf32>
    %48 = arith.mulf %46, %47 : vector<8x16x128xf32>
    %49 = arith.addf %42, %48 : vector<8x16x128xf32>
    %c3 = arith.constant 3 : index
    %c0_30 = arith.constant 0 : index
    %50 = vector.load %arg6[%c3, %c0_30] : memref<9x128xf32, #tpu.memory_space<vmem>>, vector<1x128xf32>
    %51 = vector.shape_cast %50 : vector<1x128xf32> to vector<1x1x128xf32>
    %52 = vector.extract_strided_slice %43 {offsets = [1, 0, 0], sizes = [8, 16, 128], strides = [1, 1, 1]} : vector<10x16x128xf32> to vector<8x16x128xf32>
    %53 = vector.broadcast %51 : vector<1x1x128xf32> to vector<8x16x128xf32>
    %54 = arith.mulf %52, %53 : vector<8x16x128xf32>
    %55 = arith.addf %49, %54 : vector<8x16x128xf32>
    %c6 = arith.constant 6 : index
    %c0_31 = arith.constant 0 : index
    %56 = vector.load %arg6[%c6, %c0_31] : memref<9x128xf32, #tpu.memory_space<vmem>>, vector<1x128xf32>
    %57 = vector.shape_cast %56 : vector<1x128xf32> to vector<1x1x128xf32>
    %58 = vector.extract_strided_slice %43 {offsets = [2, 0, 0], sizes = [8, 16, 128], strides = [1, 1, 1]} : vector<10x16x128xf32> to vector<8x16x128xf32>
    %59 = vector.broadcast %57 : vector<1x1x128xf32> to vector<8x16x128xf32>
    %60 = arith.mulf %58, %59 : vector<8x16x128xf32>
    %61 = arith.addf %55, %60 : vector<8x16x128xf32>
    %c0_32 = arith.constant 0 : index
    %c1_33 = arith.constant 1 : index
    %c0_34 = arith.constant 0 : index
    %62 = vector.load %arg11[%c0_32, %c1_33, %c0_34] : memref<10x18x128xf32, #tpu.memory_space<vmem>>, vector<10x16x128xf32>
    %c1_35 = arith.constant 1 : index
    %c0_36 = arith.constant 0 : index
    %63 = vector.load %arg6[%c1_35, %c0_36] : memref<9x128xf32, #tpu.memory_space<vmem>>, vector<1x128xf32>
    %64 = vector.shape_cast %63 : vector<1x128xf32> to vector<1x1x128xf32>
    %65 = vector.extract_strided_slice %62 {offsets = [0, 0, 0], sizes = [8, 16, 128], strides = [1, 1, 1]} : vector<10x16x128xf32> to vector<8x16x128xf32>
    %66 = vector.broadcast %64 : vector<1x1x128xf32> to vector<8x16x128xf32>
    %67 = arith.mulf %65, %66 : vector<8x16x128xf32>
    %68 = arith.addf %61, %67 : vector<8x16x128xf32>
    %c4 = arith.constant 4 : index
    %c0_37 = arith.constant 0 : index
    %69 = vector.load %arg6[%c4, %c0_37] : memref<9x128xf32, #tpu.memory_space<vmem>>, vector<1x128xf32>
    %70 = vector.shape_cast %69 : vector<1x128xf32> to vector<1x1x128xf32>
    %71 = vector.extract_strided_slice %62 {offsets = [1, 0, 0], sizes = [8, 16, 128], strides = [1, 1, 1]} : vector<10x16x128xf32> to vector<8x16x128xf32>
    %72 = vector.broadcast %70 : vector<1x1x128xf32> to vector<8x16x128xf32>
    %73 = arith.mulf %71, %72 : vector<8x16x128xf32>
    %74 = arith.addf %68, %73 : vector<8x16x128xf32>
    %c7 = arith.constant 7 : index
    %c0_38 = arith.constant 0 : index
    %75 = vector.load %arg6[%c7, %c0_38] : memref<9x128xf32, #tpu.memory_space<vmem>>, vector<1x128xf32>
    %76 = vector.shape_cast %75 : vector<1x128xf32> to vector<1x1x128xf32>
    %77 = vector.extract_strided_slice %62 {offsets = [2, 0, 0], sizes = [8, 16, 128], strides = [1, 1, 1]} : vector<10x16x128xf32> to vector<8x16x128xf32>
    %78 = vector.broadcast %76 : vector<1x1x128xf32> to vector<8x16x128xf32>
    %79 = arith.mulf %77, %78 : vector<8x16x128xf32>
    %80 = arith.addf %74, %79 : vector<8x16x128xf32>
    %c0_39 = arith.constant 0 : index
    %c2 = arith.constant 2 : index
    %c0_40 = arith.constant 0 : index
    %81 = vector.load %arg11[%c0_39, %c2, %c0_40] : memref<10x18x128xf32, #tpu.memory_space<vmem>>, vector<10x16x128xf32>
    %c2_41 = arith.constant 2 : index
    %c0_42 = arith.constant 0 : index
    %82 = vector.load %arg6[%c2_41, %c0_42] : memref<9x128xf32, #tpu.memory_space<vmem>>, vector<1x128xf32>
    %83 = vector.shape_cast %82 : vector<1x128xf32> to vector<1x1x128xf32>
    %84 = vector.extract_strided_slice %81 {offsets = [0, 0, 0], sizes = [8, 16, 128], strides = [1, 1, 1]} : vector<10x16x128xf32> to vector<8x16x128xf32>
    %85 = vector.broadcast %83 : vector<1x1x128xf32> to vector<8x16x128xf32>
    %86 = arith.mulf %84, %85 : vector<8x16x128xf32>
    %87 = arith.addf %80, %86 : vector<8x16x128xf32>
    %c5 = arith.constant 5 : index
    %c0_43 = arith.constant 0 : index
    %88 = vector.load %arg6[%c5, %c0_43] : memref<9x128xf32, #tpu.memory_space<vmem>>, vector<1x128xf32>
    %89 = vector.shape_cast %88 : vector<1x128xf32> to vector<1x1x128xf32>
    %90 = vector.extract_strided_slice %81 {offsets = [1, 0, 0], sizes = [8, 16, 128], strides = [1, 1, 1]} : vector<10x16x128xf32> to vector<8x16x128xf32>
    %91 = vector.broadcast %89 : vector<1x1x128xf32> to vector<8x16x128xf32>
    %92 = arith.mulf %90, %91 : vector<8x16x128xf32>
    %93 = arith.addf %87, %92 : vector<8x16x128xf32>
    %c8 = arith.constant 8 : index
    %c0_44 = arith.constant 0 : index
    %94 = vector.load %arg6[%c8, %c0_44] : memref<9x128xf32, #tpu.memory_space<vmem>>, vector<1x128xf32>
    %95 = vector.shape_cast %94 : vector<1x128xf32> to vector<1x1x128xf32>
    %96 = vector.extract_strided_slice %81 {offsets = [2, 0, 0], sizes = [8, 16, 128], strides = [1, 1, 1]} : vector<10x16x128xf32> to vector<8x16x128xf32>
    %97 = vector.broadcast %95 : vector<1x1x128xf32> to vector<8x16x128xf32>
    %98 = arith.mulf %96, %97 : vector<8x16x128xf32>
    %99 = arith.addf %93, %98 : vector<8x16x128xf32>
    %cst_45 = arith.constant 0.000000e+00 : f32
    %100 = vector.broadcast %cst_45 : f32 to vector<8x16x128xf32>
    %101 = arith.cmpf oge, %99, %100 : vector<8x16x128xf32>
    %102 = vector.extract_strided_slice %0 {offsets = [3, 0], sizes = [1, 128], strides = [1, 1]} : vector<4x128xf32> to vector<1x128xf32>
    %103 = vector.shape_cast %102 : vector<1x128xf32> to vector<1x1x128xf32>
    %104 = vector.broadcast %103 : vector<1x1x128xf32> to vector<8x16x128xf32>
    %105 = arith.mulf %104, %99 : vector<8x16x128xf32>
    %106 = arith.select %101, %99, %105 : vector<8x16x128xi1>, vector<8x16x128xf32>
    %107 = vector.shape_cast %106 : vector<8x16x128xf32> to vector<128x128xf32>
    %108 = arith.truncf %107 : vector<128x128xf32> to vector<128x128xbf16>
    %c0_46 = arith.constant 0 : index
    %c0_47 = arith.constant 0 : index
    %109 = vector.load %arg8[%c0_46, %c0_47] : memref<128x128xbf16, #tpu.memory_space<vmem>>, vector<128x128xbf16>
    %cst_48 = arith.constant dense<0.000000e+00> : vector<128x128xf32>
    %110 = tpu.matmul %108, %109, %cst_48 {dimension_numbers = #tpu.dot_dimension_numbers<[1], [0], [0], [1], [0, 0, 1, 1], [], []>} : vector<128x128xbf16>, vector<128x128xbf16>, vector<128x128xf32> -> vector<128x128xf32>
    %c0_49 = arith.constant 0 : index
    %c0_50 = arith.constant 0 : index
    %111 = vector.load %arg9[%c0_49, %c0_50] : memref<1x128xf32, #tpu.memory_space<vmem>>, vector<1x128xf32>
    %112 = vector.broadcast %111 : vector<1x128xf32> to vector<128x128xf32>
    %113 = arith.addf %110, %112 : vector<128x128xf32>
    %114 = vector.shape_cast %113 : vector<128x128xf32> to vector<8x16x128xf32>
    %c0_51 = arith.constant 0 : index
    %c0_52 = arith.constant 0 : index
    %c0_53 = arith.constant 0 : index
    %c0_54 = arith.constant 0 : index
    %115 = vector.load %arg3[%c0_51, %c0_52, %c0_53, %c0_54] : memref<1x8x16x128xbf16, #tpu.memory_space<vmem>>, vector<1x8x16x128xbf16>
    %116 = vector.shape_cast %115 : vector<1x8x16x128xbf16> to vector<8x16x128xbf16>
    %117 = arith.extf %116 : vector<8x16x128xbf16> to vector<8x16x128xf32>
    %118 = arith.addf %114, %117 : vector<8x16x128xf32>
    %119 = arith.truncf %118 : vector<8x16x128xf32> to vector<8x16x128xbf16>
    %c0_55 = arith.constant 0 : index
    %c0_56 = arith.constant 0 : index
    %c0_57 = arith.constant 0 : index
    %c0_58 = arith.constant 0 : index
    %120 = vector.load %arg10[%c0_55, %c0_56, %c0_57, %c0_58] : memref<1x8x16x128xbf16, #tpu.memory_space<vmem>>, vector<1x8x16x128xbf16>
    %121 = vector.shape_cast %120 : vector<1x8x16x128xbf16> to vector<8x16x128xbf16>
    %122 = vector.shape_cast %119 : vector<8x16x128xbf16> to vector<1x8x16x128xbf16>
    tpu.vector_store %arg10[%c0_55, %c0_56, %c0_57, %c0_58], %122 {strides = array<i32>} : memref<1x8x16x128xbf16, #tpu.memory_space<vmem>>, vector<1x8x16x128xbf16>,
    return
  }
  func.func @transform_0(%arg0: i32, %arg1: i32) -> (i32, i32, i32, i32) {
    %c8_i32 = arith.constant 8 : i32
    %0 = arith.muli %arg1, %c8_i32 : i32
    %c1_i32 = arith.constant 1 : i32
    %1 = arith.subi %0, %c1_i32 : i32
    %c0_i32 = arith.constant 0 : i32
    %2 = arith.maxsi %1, %c0_i32 : i32
    %c0_i32_0 = arith.constant 0 : i32
    %c0_i32_1 = arith.constant 0 : i32
    %c0_i32_2 = arith.constant 0 : i32
    return %arg0, %2, %c0_i32_0, %c0_i32_1 : i32, i32, i32, i32
  }
  func.func @transform_1(%arg0: i32, %arg1: i32) -> (i32, i32, i32, i32) {
    %c0_i32 = arith.constant 0 : i32
    %c0_i32_0 = arith.constant 0 : i32
    %c0_i32_1 = arith.constant 0 : i32
    return %arg0, %arg1, %c0_i32, %c0_i32_0 : i32, i32, i32, i32
  }
  func.func @transform_2(%arg0: i32, %arg1: i32) -> (i32, i32, i32, i32) {
    %c1_i32 = arith.constant 1 : i32
    %0 = arith.addi %arg1, %c1_i32 : i32
    %c8_i32 = arith.constant 8 : i32
    %1 = arith.muli %0, %c8_i32 : i32
    %c15_i32 = arith.constant 15 : i32
    %2 = arith.minsi %1, %c15_i32 : i32
    %c0_i32 = arith.constant 0 : i32
    %c0_i32_0 = arith.constant 0 : i32
    %c0_i32_1 = arith.constant 0 : i32
    return %arg0, %2, %c0_i32, %c0_i32_0 : i32, i32, i32, i32
  }
  func.func @transform_3(%arg0: i32, %arg1: i32) -> (i32, i32) {
    %c0_i32 = arith.constant 0 : i32
    %c0_i32_0 = arith.constant 0 : i32
    %c0_i32_1 = arith.constant 0 : i32
    return %c0_i32, %c0_i32_0 : i32, i32
  }
  func.func @transform_4(%arg0: i32, %arg1: i32) -> (i32, i32) {
    %c0_i32 = arith.constant 0 : i32
    %c0_i32_0 = arith.constant 0 : i32
    %c0_i32_1 = arith.constant 0 : i32
    return %c0_i32, %c0_i32_0 : i32, i32
  }
  func.func @transform_5(%arg0: i32, %arg1: i32) -> (i32, i32) {
    %c0_i32 = arith.constant 0 : i32
    %c0_i32_0 = arith.constant 0 : i32
    %c0_i32_1 = arith.constant 0 : i32
    return %c0_i32, %c0_i32_0 : i32, i32
  }
  func.func @transform_6(%arg0: i32, %arg1: i32) -> (i32, i32) {
    %c0_i32 = arith.constant 0 : i32
    %c0_i32_0 = arith.constant 0 : i32
    %c0_i32_1 = arith.constant 0 : i32
    return %c0_i32, %c0_i32_0 : i32, i32
  }
  func.func @transform_7(%arg0: i32, %arg1: i32) -> (i32, i32) {
    %c0_i32 = arith.constant 0 : i32
    %c0_i32_0 = arith.constant 0 : i32
    %c0_i32_1 = arith.constant 0 : i32
    return %c0_i32, %c0_i32_0 : i32, i32
  }
  func.func @transform_8(%arg0: i32, %arg1: i32) -> (i32, i32, i32, i32) {
    %c0_i32 = arith.constant 0 : i32
    %c0_i32_0 = arith.constant 0 : i32
    %c0_i32_1 = arith.constant 0 : i32
    return %arg0, %arg1, %c0_i32, %c0_i32_0 : i32, i32, i32, i32
  }
}

</mosaic_0001>

<bundles_post_ra>
// kernel: residual_forward.2
= control target key start
LH: loop header
LB: loop body
LE: loop exit
PB: predicated region body
PF: predicated region fallthrough
CT: control target
= control target key end

     0   :  { %s2274_s27 = smov 0   ;;  %s2276_s28 = smov 0   ;;  %s3145_s0 = inlined_call_operand.vmem [shape: bf16[2,16,16,128], index: 0, kind: input, shape index: {}, may-alias: {0,1,2}]   ;;  %s3146_s1 = inlined_call_operand.vmem [shape: bf16[2,16,16,128], index: 1, kind: input, shape index: {}, may-alias: {0,1,2}]   ;;  %s3147_s2 = inlined_call_operand.vmem [shape: bf16[2,16,16,128], index: 2, kind: input, shape index: {}, may-alias: {0,1,2}]   ;;  %s3148_s3 = inlined_call_operand.vmem [shape: bf16[128,128], index: 3, kind: input, shape index: {}]   ;;  %s3149_s4 = inlined_call_operand.vmem [shape: f32[9,128], index: 4, kind: input, shape index: {}]   ;;  %s3150_s5 = inlined_call_operand.vmem [shape: f32[4,128], index: 5, kind: input, shape index: {}]   ;;  %s3151_s6 = inlined_call_operand.vmem [shape: bf16[128,128], index: 6, kind: input, shape index: {}]   ;;  %s3152_s7 = inlined_call_operand.vmem [shape: f32[1,128], index: 7, kind: input, shape index: {}]   ;;  %s3153_s8 = inlined_call_operand.vmem [shape: bf16[2,16,16,128], index: 8, kind: output, shape index: {}]  }
   0x1   :  { %s2278_s29 = smov 0   ;;  %s2280_s30 = smov 0  }
   0x2   :  { %s2282_s9 = smov 0  }
   0x3 LB: > { %s27_s10 = sadd.s32 1, %s2218_s29  ;;  %s30_s11 = sadd.s32 1, %s2222_s30  ;;  %s2226_s9 = sphi %s2282_s9, %s18_s9   ;;  %s2222_s30 = sphi %s2280_s30, %s3184_s30   ;;  %s2218_s29 = sphi %s2278_s29, %s3183_s29   ;;  %s2214_s28 = sphi %s2276_s28, %s3182_s28   ;;  %s2210_s27 = sphi %s2274_s27, %s3181_s27  }
   0x4   : > { %p28_p0 = scmp.ge.s32.totalorder %s27_s10, 2  ;;  %p1827_p1 = scmp.ge.s32.totalorder %s2226_s9, 1 }
   0x5   : > { %p348_p2 = scmp.lt.s32.totalorder %s2226_s9, 5 }
   0x6   : > { %s3186_s10 = smov (%p28_p0, %s27_s10), 0  ;;  %s3188_s11 = smov (!%p28_p0, %s30_s11), %s2222_s30 }
   0x7   : > { %p349_p3 = pnand %p1827_p1, %p348_p2  ;;  %p32_p4 = scmp.ge.s32.totalorder %s3188_s11, 2 }
   0x9   : > { %s3190_s11 = smov (%p32_p4, %s3188_s11), 0  ;;  %352 = sbr.rel (%p349_p3) target bundleno = 609 (0x261), region = 52 }
  0x10   : > { %v2162_v0 = vld [vmem:[%s3148_s3] sm:$0xff]   ;;  %s2307_s14 = sshll.u32 %s2210_s27, 3  ;;  %v2163_v1 = vld [vmem:[%s3148_s3 + $0x8] sm:$0xff]   ;;  %p422_p6 = scmp.lt.s32.totalorder %s2214_s28, 1  ;;  %v2164_v2 = vld [vmem:[%s3148_s3 + $0x10] sm:$0xff]   ;;  %v2228_v18 = vmov 0.0   ;;  %v512_v27 = vlaneseq }
  0x11   : > { %s2313_s17 = sadd.s32 4294967295, %s2307_s14  ;;  %2053 = vmatprep.subr.bf16.mxu0 %v2162_v0  ;;  %v2165_v3 = vld [vmem:[%s3148_s3 + $0x18] sm:$0xff]   ;;  %p438_p8 = scmp.lt.s32.totalorder %s2307_s14, 15  ;;  %v2166_v4 = vld [vmem:[%s3148_s3 + $0x20] sm:$0xff]   ;;  %v2167_v6 = vld [vmem:[%s3148_s3 + $0x28] sm:$0xff]  }
  0x12   : > { %p420_p5 = scmp.gt.s32.totalorder %s2313_s17, 0  ;;  %2054 = vmatpush3.bf16.msra.mxu0 %v2162_v0  ;;  %s3192_s28 = smov (!%p422_p6, %s2214_s28), 1  ;;  %v2168_v7 = vld [vmem:[%s3148_s3 + $0x30] sm:$0xff]   ;;  %v2169_v8 = vld [vmem:[%s3148_s3 + $0x38] sm:$0xff]   ;;  %883 = vst [vmem:[#allocation2] sm:$0x1] %v2228_v18  ;;  %v803_v29 = vstv %s2313_s17 }
  0x13   : > { %2055 = vmatprep.subr.bf16.mxu0 %v2163_v1  ;;  %p1830_p7 = scmp.lt.s32.totalorder %s2313_s17, 15  ;;  %s2321_s21 = sshll.u32 %s3192_s28, 5  ;;  %884 = vst [vmem:[#allocation2 + $0x18] sm:$0x1] %v2228_v18  ;;  %885 = vst [vmem:[#allocation2 + $0x30] sm:$0x1] %v2228_v18 }
  0x14   : > { %s421_s20 = scalar_select %p420_p5, %s2313_s17, 0  ;;  %893 = vst [vmem:[#allocation2 + $0x11] sm:$0x1] %v2228_v18  ;;  %894 = vst [vmem:[#allocation2 + $0x29] sm:$0x1] %v2228_v18  ;;  %v2180_v19 = vld [vmem:[%s3151_s6] sm:$0xff]  }
  0x15   : > { %s1916_s24 = sadd.s32 8, %s2307_s14  ;;  %s3196_s14 = smov (!%p438_p8, %s2307_s14), 15  ;;  %895 = vst [vmem:[#allocation2 + $0x41] sm:$0x1] %v2228_v18  ;;  %886 = vst [vmem:[#allocation2 + $0x48] sm:$0x1] %v2228_v18  ;;  %2089 = vmatprep.subr.bf16.mxu1 %v2180_v19 }
  0x16   : > { %2056 = vmatpush3.bf16.msra.mxu0 %v2163_v1  ;;  %s3194_s20 = smov (!%p1830_p7, %s421_s20), 15  ;;  %p2328_p9 = scmp.lt.s32.totalorder %s1916_s24, 15  ;;  %887 = vst [vmem:[#allocation2 + $0x60] sm:$0x1] %v2228_v18  ;;  %888 = vst [vmem:[#allocation2 + $0x78] sm:$0x1] %v2228_v18  ;;  %2090 = vmatpush3.bf16.msra.mxu1 %v2180_v19 }
  0x17   : > { %2057 = vmatprep.subr.bf16.mxu0 %v2164_v2  ;;  %s1835_s25 = sshll.u32 %s3194_s20, 1  ;;  %s1839_s22 = sshll.u32 %s3196_s14, 1  ;;  %889 = vst [vmem:[#allocation2 + $0x90] sm:$0x1] %v2228_v18  ;;  %890 = vst [vmem:[#allocation2 + $0xa8] sm:$0x1] %v2228_v18 }
  0x18   : > { %s428_s27 = sadd.s32 %s2321_s21, %s1835_s25  ;;  %s3198_s24 = smov (!%p2328_p9, %s1916_s24), 15  ;;  %891 = vst [vmem:[#allocation2 + $0xc0] sm:$0x1] %v2228_v18  ;;  %892 = vst [vmem:[#allocation2 + $0xd8] sm:$0x1] %v2228_v18  ;;  %v2181_v20 = vld [vmem:[%s3151_s6 + $0x8] sm:$0xff]  }
  0x19   : > { %s1837_s13 = sshll.u32 %s428_s27, 2  ;;  %s2346_s23 = sadd.s32 %s1839_s22, %s2321_s21  ;;  %896 = vst [vmem:[#allocation2 + $0x59] sm:$0x1] %v2228_v18  ;;  %897 = vst [vmem:[#allocation2 + $0x71] sm:$0x1] %v2228_v18  ;;  %2091 = vmatprep.subr.bf16.mxu1 %v2181_v20  ;;  %v2182_v21 = vld [vmem:[%s3151_s6 + $0x10] sm:$0xff]  }
  0x1a   : > { %2058 = vmatpush3.bf16.msra.mxu0 %v2164_v2  ;;  %s430_s18 = scalar_lea.vmem %s3145_s0, %s1837_s13  ;;  %s1841_s25 = sshll.u32 %s2346_s23, 2  ;;  %898 = vst [vmem:[#allocation2 + $0x89] sm:$0x1] %v2228_v18  ;;  %899 = vst [vmem:[#allocation2 + $0xa1] sm:$0x1] %v2228_v18  ;;  %2092 = vmatpush3.bf16.msra.mxu1 %v2181_v20  ;;  %v2183_v22 = vld [vmem:[%s3151_s6 + $0x18] sm:$0xff]  }
  0x1b   : > { %2059 = vmatprep.subr.bf16.mxu0 %v2165_v3  ;;  %v2170_v5 = vld [vmem:[%s430_s18] sm:$0xff]   ;;  %s2354_s12 = scalar_lea.vmem %s3146_s1, %s1841_s25  ;;  %s3200_s24 = smov (!%p2328_p9, %s3198_s24), 15  ;;  %900 = vst [vmem:[#allocation2 + $0xb9] sm:$0x1] %v2228_v18  ;;  %901 = vst [vmem:[#allocation2 + $0xd1] sm:$0x1] %v2228_v18  ;;  %2093 = vmatprep.subr.bf16.mxu1 %v2182_v21 }
  0x1c   : > { %2069 = vmatprep.mubr.bf16.mxu0 %v2170_v5  ;;  %s1846_s14 = sshll.u32 %s3200_s24, 1  ;;  %v2171_v9 = vld [vmem:[%s2354_s12] sm:$0xff]   ;;  %v2172_v10 = vld [vmem:[%s2354_s12 + $0x8] sm:$0xff]   ;;  %v2173_v11 = vld [vmem:[%s2354_s12 + $0x10] sm:$0xff]   ;;  %902 = vst [vmem:[#allocation2 + $0xe9] sm:$0x1] %v2228_v18 }
  0x1d   : > { %s456_s16 = sadd.s32 %s1846_s14, %s2321_s21  ;;  %v2174_v12 = vld [vmem:[%s2354_s12 + $0x18] sm:$0xff]   ;;  %v2175_v13 = vld [vmem:[%s2354_s12 + $0x20] sm:$0xff]   ;;  %v2176_v14 = vld [vmem:[%s2354_s12 + $0x28] sm:$0xff]   ;;  %v2400_v28 = vshrl.u32 %v512_v27, 7  ;;  %v804_v33 = vadd.s32 1, %v803_v29  ;;  %v2410_v35 = vadd.s32 3, %v803_v29 }
  0x1e   : > { %2060 = vmatpush3.bf16.msra.mxu0 %v2165_v3  ;;  %s1848_s20 = sshll.u32 %s456_s16, 2  ;;  %v2177_v15 = vld [vmem:[%s2354_s12 + $0x30] sm:$0xff]   ;;  %v2178_v16 = vld [vmem:[%s2354_s12 + $0x38] sm:$0xff]   ;;  %2094 = vmatpush3.bf16.msra.mxu1 %v2182_v21  ;;  %v2184_v23 = vld [vmem:[%s3151_s6 + $0x20] sm:$0xff]   ;;  %v2412_v36 = vadd.s32 2, %v803_v29  ;;  %vm813_vm2 = vcmp.ge.s32.totalorder %v803_v29, 0 }
  0x1f   : > { %2061 = vmatprep.subr.bf16.mxu0 %v2166_v4  ;;  %s458_s26 = scalar_lea.vmem %s3147_s2, %s1848_s20  ;;  %2095 = vmatprep.subr.bf16.mxu1 %v2183_v22  ;;  %v2185_v24 = vld [vmem:[%s3151_s6 + $0x28] sm:$0xff]   ;;  %v2186_v25 = vld [vmem:[%s3151_s6 + $0x30] sm:$0xff]   ;;  %v2187_v26 = vld [vmem:[%s3151_s6 + $0x38] sm:$0xff]   ;;  %v514_v30 = vsub.s32 0, %v2400_v28  ;;  %v759_v32 = vsub.s32 1, %v2400_v28  ;;  %vm814_vm0 = vcmp.ge.s32.totalorder %v804_v33, 0 }
  0x20   : > { %v2179_v17 = vld [vmem:[%s458_s26] sm:$0xff]   ;;  %vm824_vm1 = vcmp.lt.s32.totalorder %v804_v33, 16  ;;  %vm823_vm3 = vcmp.lt.s32.totalorder %v803_v29, 16  ;;  %vm816_vm4 = vcmp.ge.s32.totalorder %v2410_v35, 0  ;;  %vm826_vm5 = vcmp.lt.s32.totalorder %v2410_v35, 16  ;;  %s3102_s26 = scalar_lea.vmem %s3153_s8, %s1841_s25 }
  0x21   : > { %v475_v31 = vld [vmem:[%s3150_s5] sm:$0xf]  ;;  %vm815_vm6 = vcmp.ge.s32.totalorder %v2412_v36, 0  ;;  %vm825_vm7 = vcmp.lt.s32.totalorder %v2412_v36, 16  ;;  %v925_v43 = vsub.s32 2, %v2400_v28  ;;  %vm2425_vm9 = vmand %vm814_vm0, %vm824_vm1  ;;  %v2430_v48 = vadd.s32 5, %v803_v29 }
  0x22   : > { %2062 = vmatpush3.bf16.msra.mxu0 %v2166_v4  ;;  %2096 = vmatpush3.bf16.msra.mxu1 %v2183_v22  ;;  %v2408_v34 = vrot.slane %v475_v31, %v514_v30  ;;  %v2414_v37 = vrot.slane %v475_v31, %v759_v32  ;;  %vm2435_vm11 = vmand %vm813_vm2, %vm823_vm3  ;;  %v2440_v52 = vadd.s32 4, %v803_v29  ;;  %v1338_v55 = vsub.s32 3, %v2400_v28  ;;  %v2456_v63 = vld [vmem:[%s3149_s4 + $0x1] ss:$0 sm:$0xff]  ;;  %v2461_v0 = vld [vmem:[%s3149_s4 + $0x4] ss:$0 sm:$0xff] }
  0x23   : > { %2063 = vmatprep.subr.bf16.mxu0 %v2167_v6  ;;  %2097 = vmatprep.subr.bf16.mxu1 %v2184_v23  ;;  %v2449_v61 = vadd.s32 7, %v803_v29  ;;  %v2451_v62 = vrot.slane %v475_v31, %v925_v43  ;;  %vm818_vm14 = vcmp.ge.s32.totalorder %v2430_v48, 0  ;;  %vm828_vm15 = vcmp.lt.s32.totalorder %v2430_v48, 16  ;;  %vm2495_vm3 = vmand %vm816_vm4, %vm826_vm5  ;;  %v2615_v22 = vld [vmem:[%s3149_s4 + $0x7] ss:$0 sm:$0xff] }
  0x24   : > { %v2467_v4 = vadd.s32 6, %v803_v29  ;;  %v2469_v5 = vadd.s32 9, %v803_v29  ;;  %vm817_vm0 = vcmp.ge.s32.totalorder %v2440_v52, 0  ;;  %vm827_vm1 = vcmp.lt.s32.totalorder %v2440_v52, 16 }
  0x26   : > { %2064 = vmatpush3.bf16.msra.mxu0 %v2167_v6  ;;  %2098 = vmatpush3.bf16.msra.mxu1 %v2184_v23 }
  0x27   : > { %2065 = vmatprep.subr.bf16.mxu0 %v2168_v7  ;;  %2099 = vmatprep.subr.bf16.mxu1 %v2185_v24 }
  0x2a   : > { %2066 = vmatpush3.bf16.msra.mxu0 %v2168_v7  ;;  %2100 = vmatpush3.bf16.msra.mxu1 %v2185_v24  ;;  %v2516_v24 = vld [vmem:[%s3149_s4] ss:$0 sm:$0xff] }
  0x2b   : > { %2067 = vmatprep.subr.bf16.mxu0 %v2169_v8  ;;  %2101 = vmatprep.subr.bf16.mxu1 %v2186_v25 }
  0x2e   : > { %2068 = vmatpush3.bf16.msra.mxu0 %v2169_v8  ;;  %2102 = vmatpush3.bf16.msra.mxu1 %v2186_v25  ;;  %v2521_v25 = vld [vmem:[%s3149_s4 + $0x3] ss:$0 sm:$0xff] }
  0x2f   : > { %2103 = vmatprep.subr.bf16.mxu1 %v2187_v26 }
  0x31   : > { %2070 = vmatmul.mubr.bf16.vlgmr.msra.gmra.mrb[0].mxu0 %v2171_v9  ;;  %v2476_v9 = vadd.s32 8, %v803_v29 }
  0x32   : > { %2073 = vmatprep.mubr.bf16.mxu0 %v2172_v10  ;;  %2104 = vmatpush3.bf16.msra.mxu1 %v2187_v26  ;;  %v2478_v10 = vrot.slane %v475_v31, %v1338_v55 }
  0x39   : > { %2074 = vmatmul.mubr.bf16.gmra.mrb[4].mxu0 %v2173_v11 }
  0x3a   : > { %2077 = vmatprep.mubr.bf16.mxu0 %v2174_v12 }
  0x41   : > { %2078 = vmatmul.mubr.bf16.gmra.mrb[8].mxu0 %v2175_v13 }
  0x42   : > { %2081 = vmatprep.mubr.bf16.mxu0 %v2176_v14 }
  0x49   : > { %2082 = vmatmul.mubr.bf16.gmra.mrb[12].mxu0 %v2177_v15 }
  0x4a   : > { %2085 = vmatprep.mubr.bf16.mxu0 %v2178_v16 }
  0x51   : > { %2086 = vmatmul.mubr.bf16.gmra.mrb[16].mxu0 %v2179_v17 }
 0x104   : > { %v2071_v38 = vpop.f32.mrb[0].mxu0 }
 0x105   : > { %v667_v39 = vadd.f32 %v2071_v38, %v2408_v34  ;;  %v658_v40 = vpop.f32.mrb[1].mxu0 }
 0x106   : > { %v659_v41 = vadd.f32 %v658_v40, %v2408_v34  ;;  %v2072_v42 = vpop.f32.mrb[2].mxu0 }
 0x107   : > { %vm739_vm8 = vcmp.ge.f32.partialorder %v667_v39, 0.0  ;;  %v763_v44 = vmul.f32 %v2414_v37, %v667_v39  ;;  %v670_v46 = vadd.f32 %v2072_v42, %v2408_v34  ;;  %v661_v47 = vpop.f32.mrb[3].mxu0 }
 0x108   : > { %vm737_vm10 = vcmp.ge.f32.partialorder %v659_v41, 0.0  ;;  %v761_v49 = vmul.f32 %v2414_v37, %v659_v41  ;;  %v662_v51 = vadd.f32 %v661_v47, %v2408_v34 }
 0x109   : > { %v783_v53 = vsel %vm739_vm8, %v667_v39, %v763_v44  ;;  %vm740_vm12 = vcmp.ge.f32.partialorder %v670_v46, 0.0  ;;  %v764_v54 = vmul.f32 %v2414_v37, %v670_v46 }
 0x10a   : > { %v865_v56 = vsel %vm2425_vm9, %v783_v53, 0.0  ;;  %v781_v57 = vsel %vm737_vm10, %v659_v41, %v761_v49  ;;  %vm738_vm13 = vcmp.ge.f32.partialorder %v662_v51, 0.0  ;;  %v762_v58 = vmul.f32 %v2414_v37, %v662_v51 }
 0x10b   : > { %905 = vst [vmem:[#allocation2 + $0x19] sm:$0xff] %v865_v56  ;;  %v863_v59 = vsel %vm2435_vm11, %v781_v57, 0.0  ;;  %v784_v60 = vsel %vm740_vm12, %v670_v46, %v764_v54  ;;  %v2485_v14 = vmul.f32 %v2456_v63, %v865_v56  ;;  %v2488_v15 = vmul.f32 %v2461_v0, %v865_v56 }
 0x10c   : > { %903 = vst [vmem:[#allocation2 + $0x1] sm:$0xff] %v863_v59  ;;  %v866_v1 = vsel %vm2425_vm9, %v784_v60, 0.0  ;;  %v782_v2 = vsel %vm738_vm13, %v662_v51, %v762_v58  ;;  %v2075_v3 = vpop.f32.mrb[4].mxu0  ;;  %v2482_v13 = vmul.f32 %v2456_v63, %v863_v59  ;;  %vm2508_vm9 = vmand %vm815_vm6, %vm825_vm7  ;;  %vm820_vm6 = vcmp.ge.s32.totalorder %v2449_v61, 0 }
 0x10d   : > { %906 = vst [vmem:[#allocation2 + $0x21] sm:$0xff] %v866_v1  ;;  %v864_v6 = vsel %vm2435_vm11, %v782_v2, 0.0  ;;  %v683_v7 = vadd.f32 %v2075_v3, %v2408_v34  ;;  %v674_v8 = vpop.f32.mrb[5].mxu0  ;;  %v2501_v20 = vmul.f32 %v2456_v63, %v866_v1  ;;  %v2524_v26 = vmul.f32 %v2461_v0, %v866_v1  ;;  %vm2581_vm13 = vmand %vm818_vm14, %vm828_vm15 }
 0x10e   : > { %904 = vst [vmem:[#allocation2 + $0x9] sm:$0xff] %v864_v6  ;;  %v675_v11 = vadd.f32 %v674_v8, %v2408_v34  ;;  %v2076_v12 = vpop.f32.mrb[6].mxu0  ;;  %v2528_v29 = vmul.f32 %v2456_v63, %v864_v6  ;;  %vm830_vm7 = vcmp.lt.s32.totalorder %v2449_v61, 16  ;;  %vm819_vm10 = vcmp.ge.s32.totalorder %v2467_v4, 0 }
 0x10f   : > { %vm743_vm2 = vcmp.ge.f32.partialorder %v683_v7, 0.0  ;;  %v767_v16 = vmul.f32 %v2414_v37, %v683_v7  ;;  %v686_v18 = vadd.f32 %v2076_v12, %v2408_v34  ;;  %v677_v19 = vpop.f32.mrb[7].mxu0  ;;  %vm829_vm11 = vcmp.lt.s32.totalorder %v2467_v4, 16 }
 0x110   : > { %vm741_vm8 = vcmp.ge.f32.partialorder %v675_v11, 0.0  ;;  %v765_v21 = vmul.f32 %v2414_v37, %v675_v11  ;;  %v678_v23 = vadd.f32 %v677_v19, %v2408_v34 }
 0x111   : > { %v787_v27 = vsel %vm743_vm2, %v683_v7, %v767_v16  ;;  %vm744_vm4 = vcmp.ge.f32.partialorder %v686_v18, 0.0  ;;  %v768_v28 = vmul.f32 %v2414_v37, %v686_v18 }
 0x112   : > { %v2532_v30 = vsel %vm2495_vm3, %v787_v27, 0.0  ;;  %v785_v31 = vsel %vm741_vm8, %v675_v11, %v765_v21  ;;  %vm742_vm5 = vcmp.ge.f32.partialorder %v678_v23, 0.0  ;;  %v766_v32 = vmul.f32 %v2414_v37, %v678_v23  ;;  %v929_v33 = vld [vmem:[#allocation2 + $0x18] sm:$0xff]  ;;  %v2610_v21 = vld [vmem:[%s3149_s4 + $0x6] ss:$0 sm:$0xff] }
 0x113   : > { %909 = vst [vmem:[#allocation2 + $0x49] sm:$0xff] %v2532_v30  ;;  %v2538_v35 = vsel %vm2508_vm9, %v785_v31, 0.0  ;;  %v788_v36 = vsel %vm744_vm4, %v686_v18, %v768_v28  ;;  %v927_v38 = vld [vmem:[#allocation2] sm:$0xff]  ;;  %v2541_v39 = vmul.f32 %v2516_v24, %v929_v33  ;;  %v989_v40 = vmul.f32 %v2521_v25, %v929_v33 }
 0x114   : > { %907 = vst [vmem:[#allocation2 + $0x31] sm:$0xff] %v2538_v35  ;;  %v2547_v41 = vsel %vm2495_vm3, %v788_v36, 0.0  ;;  %v786_v42 = vsel %vm742_vm5, %v678_v23, %v766_v32  ;;  %v2079_v43 = vpop.f32.mrb[8].mxu0  ;;  %v930_v44 = vld [vmem:[#allocation2 + $0x20] sm:$0xff]  ;;  %v952_v45 = vmul.f32 %v2516_v24, %v927_v38  ;;  %v2554_v46 = vmul.f32 %v2456_v63, %v2538_v35  ;;  %vm2595_vm3 = vmand %vm817_vm0, %vm827_vm1 }
 0x115   : > { %910 = vst [vmem:[#allocation2 + $0x51] sm:$0xff] %v2547_v41  ;;  %v2559_v47 = vsel %vm2508_vm9, %v786_v42, 0.0  ;;  %v699_v49 = vadd.f32 %v2079_v43, %v2408_v34  ;;  %v690_v50 = vpop.f32.mrb[9].mxu0  ;;  %v928_v51 = vld [vmem:[#allocation2 + $0x8] sm:$0xff]  ;;  %v2565_v53 = vmul.f32 %v2516_v24, %v930_v44  ;;  %v990_v54 = vmul.f32 %v2521_v25, %v930_v44  ;;  %vm2664_vm5 = vmand %vm820_vm6, %vm830_vm7 }
 0x116   : > { %908 = vst [vmem:[#allocation2 + $0x39] sm:$0xff] %v2559_v47  ;;  %v691_v55 = vadd.f32 %v690_v50, %v2408_v34  ;;  %v2080_v56 = vpop.f32.mrb[10].mxu0  ;;  %v953_v57 = vmul.f32 %v2516_v24, %v928_v51  ;;  %v968_v58 = vadd.f32 %v952_v45, %v2451_v62  ;;  %v2574_v59 = vmul.f32 %v2456_v63, %v2559_v47 }
 0x117   : > { %vm747_vm12 = vcmp.ge.f32.partialorder %v699_v49, 0.0  ;;  %v771_v60 = vmul.f32 %v2414_v37, %v699_v49  ;;  %v702_v2 = vadd.f32 %v2080_v56, %v2408_v34  ;;  %v693_v3 = vpop.f32.mrb[11].mxu0  ;;  %v2588_v6 = vmul.f32 %v2461_v0, %v2538_v35 }
 0x118   : > { %vm745_vm2 = vcmp.ge.f32.partialorder %v691_v55, 0.0  ;;  %v769_v7 = vmul.f32 %v2414_v37, %v691_v55  ;;  %v694_v8 = vadd.f32 %v693_v3, %v2408_v34  ;;  %v969_v11 = vadd.f32 %v953_v57, %v2451_v62 }
 0x119   : > { %v791_v12 = vsel %vm747_vm12, %v699_v49, %v771_v60  ;;  %vm748_vm14 = vcmp.ge.f32.partialorder %v702_v2, 0.0  ;;  %v772_v16 = vmul.f32 %v2414_v37, %v702_v2  ;;  %v1005_v17 = vadd.f32 %v989_v40, %v968_v58 }
 0x11a   : > { %v2604_v18 = vsel %vm2581_vm13, %v791_v12, 0.0  ;;  %v789_v19 = vsel %vm745_vm2, %v691_v55, %v769_v7  ;;  %vm746_vm15 = vcmp.ge.f32.partialorder %v694_v8, 0.0  ;;  %v770_v52 = vmul.f32 %v2414_v37, %v694_v8 }
 0x11b   : > { %913 = vst [vmem:[#allocation2 + $0x79] sm:$0xff] %v2604_v18  ;;  %v2620_v23 = vsel %vm2595_vm3, %v789_v19, 0.0  ;;  %v792_v27 = vsel %vm748_vm14, %v702_v2, %v772_v16  ;;  %v931_v28 = vld [vmem:[#allocation2 + $0x30] sm:$0xff]  ;;  %v1006_v31 = vadd.f32 %v990_v54, %v969_v11  ;;  %v2624_v32 = vmul.f32 %v2461_v0, %v2559_v47  ;;  %v2684_v19 = vld [vmem:[%s3149_s4 + $0x2] ss:$0 sm:$0xff] }
 0x11c   : > { %911 = vst [vmem:[#allocation2 + $0x61] sm:$0xff] %v2620_v23  ;;  %v2629_v33 = vsel %vm2581_vm13, %v792_v27, 0.0  ;;  %v790_v36 = vsel %vm746_vm15, %v694_v8, %v770_v52  ;;  %v2083_v38 = vpop.f32.mrb[12].mxu0  ;;  %vm822_vm0 = vcmp.ge.s32.totalorder %v2469_v5, 0  ;;  %vm832_vm1 = vcmp.lt.s32.totalorder %v2469_v5, 16  ;;  %vm2674_vm13 = vmand %vm819_vm10, %vm829_vm11 }
 0x11d   : > { %v2634_v40 = vmul.f32 %v2516_v24, %v931_v28  ;;  %v2637_v42 = vmul.f32 %v2521_v25, %v931_v28  ;;  %914 = vst [vmem:[#allocation2 + $0x81] sm:$0xff] %v2629_v33  ;;  %v2642_v43 = vsel %vm2595_vm3, %v790_v36, 0.0  ;;  %v715_v44 = vadd.f32 %v2083_v38, %v2408_v34  ;;  %v706_v45 = vpop.f32.mrb[13].mxu0  ;;  %v932_v49 = vld [vmem:[#allocation2 + $0x38] sm:$0xff]  ;;  %v1190_v38 = vld [vmem:[#allocation2 + $0xa] sm:$0xff]  ;;  %vm2727_vm11 = vmand %vm822_vm0, %vm832_vm1 }
 0x11e   : > { %vm821_vm8 = vcmp.ge.s32.totalorder %v2476_v9, 0  ;;  %vm831_vm9 = vcmp.lt.s32.totalorder %v2476_v9, 16  ;;  %v1026_v50 = vmul.f32 %v2610_v21, %v931_v28  ;;  %v1157_v51 = vmul.f32 %v2615_v22, %v2538_v35  ;;  %912 = vst [vmem:[#allocation2 + $0x69] sm:$0xff] %v2642_v43  ;;  %v2084_v55 = vpop.f32.mrb[14].mxu0  ;;  %v2752_v9 = vld [vmem:[%s3149_s4 + $0x5] ss:$0 sm:$0xff] }
 0x11f   : > { %v707_v54 = vadd.f32 %v706_v45, %v2408_v34  ;;  %v2653_v56 = vmul.f32 %v2516_v24, %v932_v49  ;;  %v2656_v57 = vmul.f32 %v2521_v25, %v932_v49  ;;  %v1027_v58 = vmul.f32 %v2610_v21, %v932_v49  ;;  %v709_v2 = vpop.f32.mrb[15].mxu0  ;;  %v1192_v45 = vld [vmem:[#allocation2 + $0x22] sm:$0xff]  ;;  %vm2737_vm3 = vmand %vm821_vm8, %vm831_vm9 }
 0x120   : > { %vm751_vm4 = vcmp.ge.f32.partialorder %v715_v44, 0.0  ;;  %v775_v60 = vmul.f32 %v2414_v37, %v715_v44  ;;  %v718_v1 = vadd.f32 %v2084_v55, %v2408_v34  ;;  %v1042_v3 = vadd.f32 %v1026_v50, %v1005_v17  ;;  %v1189_v17 = vld [vmem:[#allocation2 + $0x2] sm:$0xff] }
 0x121   : > { %vm749_vm12 = vcmp.ge.f32.partialorder %v707_v54, 0.0  ;;  %v773_v7 = vmul.f32 %v2414_v37, %v707_v54  ;;  %v710_v61 = vadd.f32 %v709_v2, %v2408_v34  ;;  %v1043_v8 = vadd.f32 %v1027_v58, %v1006_v31  ;;  %v1193_v2 = vld [vmem:[#allocation2 + $0x32] sm:$0xff] }
 0x122   : > { %v795_v11 = vsel %vm751_vm4, %v715_v44, %v775_v60  ;;  %vm752_vm6 = vcmp.ge.f32.partialorder %v718_v1, 0.0  ;;  %v776_v12 = vmul.f32 %v2414_v37, %v718_v1  ;;  %v1099_v16 = vadd.f32 %v2482_v13, %v1042_v3  ;;  %v1191_v44 = vld [vmem:[#allocation2 + $0x1a] sm:$0xff] }
 0x123   : > { %v2688_v4 = vsel %vm2664_vm5, %v795_v11, 0.0  ;;  %v793_v52 = vsel %vm749_vm12, %v707_v54, %v773_v7  ;;  %vm750_vm7 = vcmp.ge.f32.partialorder %v710_v61, 0.0  ;;  %v774_v27 = vmul.f32 %v2414_v37, %v710_v61  ;;  %v1194_v7 = vld [vmem:[#allocation2 + $0x3a] sm:$0xff] }
 0x124   : > { %917 = vst [vmem:[#allocation2 + $0xa9] sm:$0xff] %v2688_v4  ;;  %v2694_v28 = vsel %vm2674_vm13, %v793_v52, 0.0  ;;  %v796_v13 = vsel %vm752_vm6, %v718_v1, %v776_v12  ;;  %v1100_v31 = vadd.f32 %v2528_v29, %v1043_v8  ;;  %v1136_v36 = vadd.f32 %v2488_v15, %v1099_v16  ;;  %v2087_v54 = vpop.f32.mrb[16].mxu0  ;;  %v2796_v52 = vld [vmem:[#allocation2 + $0x4a] sm:$0xff] }
 0x125   : > { %915 = vst [vmem:[#allocation2 + $0x91] sm:$0xff] %v2694_v28  ;;  %v2701_v49 = vsel %vm2664_vm5, %v796_v13, 0.0  ;;  %v794_v50 = vsel %vm750_vm7, %v710_v61, %v774_v27  ;;  %v1158_v55 = vmul.f32 %v2615_v22, %v2559_v47  ;;  %v1214_v58 = vmul.f32 %v2684_v19, %v1189_v17  ;;  %v722_v60 = vpop.f32.mrb[17].mxu0 }
 0x126   : > { %918 = vst [vmem:[#allocation2 + $0xb1] sm:$0xff] %v2701_v49  ;;  %v2709_v15 = vsel %vm2674_vm13, %v794_v50, 0.0  ;;  %v731_v29 = vadd.f32 %v2087_v54, %v2408_v34  ;;  %v1137_v35 = vadd.f32 %v2524_v26, %v1100_v31  ;;  %v1173_v1 = vadd.f32 %v1157_v51, %v1136_v36  ;;  %v2088_v47 = vpop.f32.mrb[18].mxu0  ;;  %v2762_v54 = vld [vmem:[%s3149_s4 + $0x8] ss:$0 sm:$0xff] }
 0x127   : > { %916 = vst [vmem:[#allocation2 + $0x99] sm:$0xff] %v2709_v15  ;;  %v723_v3 = vadd.f32 %v722_v60, %v2408_v34  ;;  %v1215_v61 = vmul.f32 %v2684_v19, %v1190_v38  ;;  %v2717_v8 = vmul.f32 %v2684_v19, %v1191_v44  ;;  %v2720_v48 = vmul.f32 %v2684_v19, %v1192_v45  ;;  %v725_v12 = vpop.f32.mrb[19].mxu0 }
 0x128   : > { %vm755_vm10 = vcmp.ge.f32.partialorder %v731_v29, 0.0  ;;  %v779_v11 = vmul.f32 %v2414_v37, %v731_v29  ;;  %v734_v51 = vadd.f32 %v2088_v47, %v2408_v34  ;;  %v1174_v16 = vadd.f32 %v1158_v55, %v1137_v35 }
 0x129   : > { %vm753_vm2 = vcmp.ge.f32.partialorder %v723_v3, 0.0  ;;  %v777_v17 = vmul.f32 %v2414_v37, %v723_v3  ;;  %v726_v5 = vadd.f32 %v725_v12, %v2408_v34  ;;  %v2743_v27 = vmul.f32 %v2684_v19, %v1193_v2  ;;  %v2776_v12 = vld [vmem:[#allocation2 + $0x48] sm:$0xff] }
 0x12a   : > { %v799_v13 = vsel %vm755_vm10, %v731_v29, %v779_v11  ;;  %vm756_vm14 = vcmp.ge.f32.partialorder %v734_v51, 0.0  ;;  %v780_v31 = vmul.f32 %v2414_v37, %v734_v51  ;;  %v2747_v36 = vmul.f32 %v2684_v19, %v1194_v7 }
 0x12b   : > { %v2756_v38 = vsel %vm2727_vm11, %v799_v13, 0.0  ;;  %v797_v34 = vsel %vm753_vm2, %v723_v3, %v777_v17  ;;  %vm754_vm15 = vcmp.ge.f32.partialorder %v726_v5, 0.0  ;;  %v778_v50 = vmul.f32 %v2414_v37, %v726_v5  ;;  %v2778_v17 = vld [vmem:[#allocation2 + $0x50] sm:$0xff] }
 0x12c   : > { %3177 = vst [vmem:[#allocation3_spill] sm:$0xff] %v2756_v38  ;;  %921 = vst [vmem:[#allocation2 + $0xd9] sm:$0xff] %v2756_v38  ;;  %v2767_v55 = vsel %vm2737_vm3, %v797_v34, 0.0  ;;  %v800_v29 = vsel %vm756_vm14, %v734_v51, %v780_v31  ;;  %v1230_v60 = vadd.f32 %v1214_v58, %v1173_v1  ;;  %v1231_v35 = vadd.f32 %v1215_v61, %v1174_v16 }
 0x12d   : > { %919 = vst [vmem:[#allocation2 + $0xc1] sm:$0xff] %v2767_v55  ;;  %v2772_v3 = vsel %vm2727_vm11, %v800_v29, 0.0  ;;  %v798_v37 = vsel %vm754_vm15, %v726_v5, %v778_v50  ;;  %v1251_v47 = vmul.f32 %v2752_v9, %v1191_v44  ;;  %v1252_v11 = vmul.f32 %v2752_v9, %v1192_v45  ;;  %v2798_v5 = vld [vmem:[#allocation2 + $0x52] sm:$0xff] }
 0x12e   : > { %3178 = vst [vmem:[#allocation4_spill] sm:$0xff] %v2772_v3  ;;  %922 = vst [vmem:[#allocation2 + $0xe1] sm:$0xff] %v2772_v3  ;;  %v2783_v58 = vsel %vm2737_vm3, %v798_v37, 0.0  ;;  %v2786_v1 = vmul.f32 %v2752_v9, %v1193_v2  ;;  %v2789_v61 = vmul.f32 %v2752_v9, %v1194_v7  ;;  %v1288_v44 = vmul.f32 %v2762_v54, %v1193_v2  ;;  %v2816_v37 = vld [vmem:[#allocation2 + $0x60] sm:$0xff] }
 0x12f   : > { %920 = vst [vmem:[#allocation2 + $0xc9] sm:$0xff] %v2783_v58  ;;  %v1267_v45 = vadd.f32 %v1251_v47, %v1230_v60  ;;  %v1268_v26 = vadd.f32 %v1252_v11, %v1231_v35  ;;  %v1289_v51 = vmul.f32 %v2762_v54, %v1194_v7  ;;  %v970_v16 = vadd.f32 %v2541_v39, %v2451_v62 }
 0x130   : > { %v971_v13 = vadd.f32 %v2565_v53, %v2451_v62  ;;  %v1028_v31 = vmul.f32 %v2610_v21, %v2776_v12  ;;  %v1029_v2 = vmul.f32 %v2610_v21, %v2778_v17  ;;  %v1159_v34 = vmul.f32 %v2615_v22, %v2532_v30 }
 0x131   : > { %v1304_v7 = vadd.f32 %v1288_v44, %v1267_v45  ;;  %v1305_v50 = vadd.f32 %v1289_v51, %v1268_v26  ;;  %v1007_v39 = vadd.f32 %v2637_v42, %v970_v16  ;;  %v1160_v29 = vmul.f32 %v2615_v22, %v2547_v41 }
 0x132   : > { %v1008_v60 = vadd.f32 %v2656_v57, %v971_v13  ;;  %v1290_v53 = vmul.f32 %v2762_v54, %v2796_v52  ;;  %v1291_v35 = vmul.f32 %v2762_v54, %v2798_v5  ;;  %v972_v47 = vadd.f32 %v2634_v40, %v2451_v62  ;;  %v2822_v57 = vld [vmem:[#allocation2 + $0x68] sm:$0xff] }
 0x133   : > { %vm1320_vm0 = vcmp.ge.f32.partialorder %v1304_v7, 0.0  ;;  %vm1321_vm1 = vcmp.ge.f32.partialorder %v1305_v50, 0.0  ;;  %v1340_v42 = vmul.f32 %v2478_v10, %v1304_v7  ;;  %v1341_v11 = vmul.f32 %v2478_v10, %v1305_v50 }
 0x134   : > { %v1044_v44 = vadd.f32 %v1028_v31, %v1007_v39  ;;  %v1045_v45 = vadd.f32 %v1029_v2, %v1008_v60  ;;  %v973_v26 = vadd.f32 %v2653_v56, %v2451_v62  ;;  %v993_v51 = vmul.f32 %v2521_v25, %v2776_v12 }
 0x135   : > { %v1356_v16 = vsel %vm1320_vm0, %v1304_v7, %v1340_v42  ;;  %v1357_v13 = vsel %vm1321_vm1, %v1305_v50, %v1341_v11  ;;  %v994_v40 = vmul.f32 %v2521_v25, %v2778_v17  ;;  %v1030_v3 = vmul.f32 %v2610_v21, %v2816_v37  ;;  %v2840_v42 = vld [vmem:[#allocation2 + $0x62] sm:$0xff] }
 0x136   : > { %v1372_v38 = vpack.c.bf16 %v1357_v13, %v1356_v16  ;;  %v1101_v31 = vadd.f32 %v2485_v14, %v1044_v44  ;;  %v1102_v2 = vadd.f32 %v2501_v20, %v1045_v45  ;;  %v1009_v39 = vadd.f32 %v993_v51, %v972_v47  ;;  %v2846_v47 = vld [vmem:[#allocation2 + $0x6a] sm:$0xff] }
 0x137   : > { %v1010_v60 = vadd.f32 %v994_v40, %v973_v26  ;;  %v1031_v56 = vmul.f32 %v2610_v21, %v2822_v57  ;;  %v1124_v7 = vmul.f32 %v2461_v0, %v2532_v30  ;;  %v1125_v50 = vmul.f32 %v2461_v0, %v2547_v41 }
 0x138   : > { %2105 = vmatprep.mubr.bf16.mxu1 %v1372_v38  ;;  %v1138_v11 = vadd.f32 %v2588_v6, %v1101_v31  ;;  %v1139_v14 = vadd.f32 %v2624_v32, %v1102_v2  ;;  %v1046_v44 = vadd.f32 %v1030_v3, %v1009_v39  ;;  %v1161_v20 = vmul.f32 %v2615_v22, %v2620_v23  ;;  %v2860_v31 = vld [vmem:[#allocation2 + $0x78] sm:$0xff] }
 0x139   : > { %v1047_v45 = vadd.f32 %v1031_v56, %v1010_v60  ;;  %v1162_v26 = vmul.f32 %v2615_v22, %v2642_v43  ;;  %v1255_v51 = vmul.f32 %v2752_v9, %v2796_v52  ;;  %v1256_v38 = vmul.f32 %v2752_v9, %v2798_v5  ;;  %v2868_v60 = vld [vmem:[#allocation2 + $0x80] sm:$0xff] }
 0x13a   : > { %v1175_v16 = vadd.f32 %v1159_v34, %v1138_v11  ;;  %v1176_v6 = vadd.f32 %v1160_v29, %v1139_v14  ;;  %v1103_v32 = vadd.f32 %v2554_v46, %v1046_v44  ;;  %v1292_v3 = vmul.f32 %v2762_v54, %v2840_v42 }
 0x13b   : > { %v1104_v13 = vadd.f32 %v2574_v59, %v1047_v45  ;;  %v1293_v40 = vmul.f32 %v2762_v54, %v2846_v47  ;;  %v958_v2 = vmul.f32 %v2516_v24, %v2776_v12  ;;  %v959_v39 = vmul.f32 %v2516_v24, %v2778_v17 }
 0x13c   : > { %v1232_v34 = vadd.f32 %v2717_v8, %v1175_v16  ;;  %v1233_v46 = vadd.f32 %v2720_v48, %v1176_v6  ;;  %v1140_v29 = vadd.f32 %v1124_v7, %v1103_v32  ;;  %v995_v59 = vmul.f32 %v2521_v25, %v2816_v37 }
 0x13d   : > { %v1141_v56 = vadd.f32 %v1125_v50, %v1104_v13  ;;  %v974_v11 = vadd.f32 %v958_v2, %v2451_v62  ;;  %v975_v14 = vadd.f32 %v959_v39, %v2451_v62  ;;  %v996_v12 = vmul.f32 %v2521_v25, %v2822_v57 }
 0x13e   : > { %v1269_v17 = vadd.f32 %v2786_v1, %v1232_v34  ;;  %v1270_v8 = vadd.f32 %v2789_v61, %v1233_v46  ;;  %v1177_v44 = vadd.f32 %v1161_v20, %v1140_v29  ;;  %v1032_v48 = vmul.f32 %v2610_v21, %v2860_v31 }
 0x13f   : > { %v1178_v7 = vadd.f32 %v1162_v26, %v1141_v56  ;;  %v1011_v45 = vadd.f32 %v995_v59, %v974_v11  ;;  %v1012_v16 = vadd.f32 %v996_v12, %v975_v14  ;;  %v1033_v50 = vmul.f32 %v2610_v21, %v2868_v60 }
 0x140   : > { %v1306_v6 = vadd.f32 %v1290_v53, %v1269_v17  ;;  %v1307_v32 = vadd.f32 %v1291_v35, %v1270_v8  ;;  %v1234_v13 = vadd.f32 %v2743_v27, %v1177_v44  ;;  %v1089_v2 = vmul.f32 %v2456_v63, %v2532_v30 }
 0x141   : > { %v1235_v1 = vadd.f32 %v2747_v36, %v1178_v7  ;;  %v1048_v61 = vadd.f32 %v1032_v48, %v1011_v45  ;;  %v1049_v20 = vadd.f32 %v1033_v50, %v1012_v16  ;;  %v1090_v39 = vmul.f32 %v2456_v63, %v2547_v41  ;;  %v2900_v7 = vld [vmem:[#allocation2 + $0x7a] sm:$0xff] }
 0x142   : > { %vm1322_vm8 = vcmp.ge.f32.partialorder %v1306_v6, 0.0  ;;  %vm1323_vm9 = vcmp.ge.f32.partialorder %v1307_v32, 0.0  ;;  %v1342_v26 = vmul.f32 %v2478_v10, %v1306_v6  ;;  %v1343_v34 = vmul.f32 %v2478_v10, %v1307_v32 }
 0x143   : > { %v1271_v53 = vadd.f32 %v1255_v51, %v1234_v13  ;;  %v1272_v35 = vadd.f32 %v1256_v38, %v1235_v1  ;;  %v1105_v46 = vadd.f32 %v1089_v2, %v1048_v61  ;;  %v1106_v27 = vadd.f32 %v1090_v39, %v1049_v20  ;;  %v2912_v61 = vld [vmem:[#allocation2 + $0x90] sm:$0xff]  ;;  %v2914_v20 = vld [vmem:[#allocation2 + $0x98] sm:$0xff] }
 0x144   : > { %v1358_v29 = vsel %vm1322_vm8, %v1306_v6, %v1342_v26  ;;  %v1359_v59 = vsel %vm1323_vm9, %v1307_v32, %v1343_v34  ;;  %v1126_v30 = vmul.f32 %v2461_v0, %v2620_v23  ;;  %v1127_v36 = vmul.f32 %v2461_v0, %v2642_v43 }
 0x145   : > { %v1373_v56 = vpack.c.bf16 %v1359_v59, %v1358_v29  ;;  %v1308_v41 = vadd.f32 %v1292_v3, %v1271_v53  ;;  %v1309_v11 = vadd.f32 %v1293_v40, %v1272_v35  ;;  %v1163_v17 = vmul.f32 %v2615_v22, %v2604_v18  ;;  %v2902_v3 = vld [vmem:[#allocation2 + $0x82] sm:$0xff] }
 0x146   : > { %v1142_v14 = vadd.f32 %v1126_v30, %v1105_v46  ;;  %v1143_v12 = vadd.f32 %v1127_v36, %v1106_v27  ;;  %v1164_v51 = vmul.f32 %v2615_v22, %v2629_v33  ;;  %v1220_v40 = vmul.f32 %v2684_v19, %v2796_v52 }
 0x147   : > { %2106 = vmatmul.mubr.bf16.vlgmr.msra.gmra.mrb[0].mxu1 %v1373_v56  ;;  %vm1324_vm4 = vcmp.ge.f32.partialorder %v1308_v41, 0.0  ;;  %vm1325_vm5 = vcmp.ge.f32.partialorder %v1309_v11, 0.0  ;;  %v1344_v38 = vmul.f32 %v2478_v10, %v1308_v41  ;;  %v1345_v8 = vmul.f32 %v2478_v10, %v1309_v11 }
 0x148   : > { %v1179_v44 = vadd.f32 %v1163_v17, %v1142_v14  ;;  %v1180_v48 = vadd.f32 %v1164_v51, %v1143_v12  ;;  %v1221_v45 = vmul.f32 %v2684_v19, %v2798_v5  ;;  %v1257_v6 = vmul.f32 %v2752_v9, %v2840_v42 }
 0x149   : > { %v1360_v16 = vsel %vm1324_vm4, %v1308_v41, %v1344_v38  ;;  %v1361_v50 = vsel %vm1325_vm5, %v1309_v11, %v1345_v8  ;;  %v1258_v1 = vmul.f32 %v2752_v9, %v2846_v47  ;;  %v1294_v52 = vmul.f32 %v2762_v54, %v2900_v7 }
 0x14a   : > { %v1374_v32 = vpack.c.bf16 %v1361_v50, %v1360_v16  ;;  %v1236_v13 = vadd.f32 %v1220_v40, %v1179_v44  ;;  %v1237_v2 = vadd.f32 %v1221_v45, %v1180_v48  ;;  %v1295_v5 = vmul.f32 %v2762_v54, %v2902_v3  ;;  %v2948_v40 = vld [vmem:[#allocation2 + $0x92] sm:$0xff] }
 0x14b   : > { %v960_v39 = vmul.f32 %v2516_v24, %v2816_v37  ;;  %v961_v26 = vmul.f32 %v2516_v24, %v2822_v57  ;;  %v997_v35 = vmul.f32 %v2521_v25, %v2860_v31  ;;  %v998_v46 = vmul.f32 %v2521_v25, %v2868_v60 }
 0x14c   : > { %2109 = vmatprep.mubr.bf16.mxu1 %v1374_v32  ;;  %v1273_v34 = vadd.f32 %v1257_v6, %v1236_v13  ;;  %v1274_v53 = vadd.f32 %v1258_v1, %v1237_v2  ;;  %v1034_v59 = vmul.f32 %v2610_v21, %v2912_v61  ;;  %v1035_v37 = vmul.f32 %v2610_v21, %v2914_v20  ;;  %v2954_v13 = vld [vmem:[#allocation2 + $0x9a] sm:$0xff]  ;;  %v2958_v1 = vld [vmem:[#allocation2 + $0xa8] sm:$0xff] }
 0x14d   : > { %v976_v27 = vadd.f32 %v960_v39, %v2451_v62  ;;  %v977_v29 = vadd.f32 %v961_v26, %v2451_v62  ;;  %v1091_v36 = vmul.f32 %v2456_v63, %v2620_v23  ;;  %v1092_v56 = vmul.f32 %v2456_v63, %v2642_v43 }
 0x14e   : > { %v1310_v57 = vadd.f32 %v1294_v52, %v1273_v34  ;;  %v1311_v30 = vadd.f32 %v1295_v5, %v1274_v53  ;;  %v1128_v14 = vmul.f32 %v2461_v0, %v2604_v18  ;;  %v1129_v12 = vmul.f32 %v2461_v0, %v2629_v33  ;;  %v2962_v5 = vld [vmem:[#allocation2 + $0xb0] sm:$0xff] }
 0x14f   : > { %v1013_v41 = vadd.f32 %v997_v35, %v976_v27  ;;  %v1014_v11 = vadd.f32 %v998_v46, %v977_v29  ;;  %v1165_v23 = vmul.f32 %v2615_v22, %v2694_v28  ;;  %v1166_v43 = vmul.f32 %v2615_v22, %v2709_v15 }
 0x150   : > { %vm1326_vm12 = vcmp.ge.f32.partialorder %v1310_v57, 0.0  ;;  %vm1327_vm13 = vcmp.ge.f32.partialorder %v1311_v30, 0.0  ;;  %v1346_v17 = vmul.f32 %v2478_v10, %v1310_v57  ;;  %v1347_v51 = vmul.f32 %v2478_v10, %v1311_v30 }
 0x151   : > { %v1050_v38 = vadd.f32 %v1034_v59, %v1013_v41  ;;  %v1051_v8 = vadd.f32 %v1035_v37, %v1014_v11  ;;  %v1222_v45 = vmul.f32 %v2684_v19, %v2840_v42  ;;  %v1223_v16 = vmul.f32 %v2684_v19, %v2846_v47 }
 0x152   : > { %v1362_v44 = vsel %vm1326_vm12, %v1310_v57, %v1346_v17  ;;  %v1363_v48 = vsel %vm1327_vm13, %v1311_v30, %v1347_v51  ;;  %v1259_v2 = vmul.f32 %v2752_v9, %v2900_v7  ;;  %v1260_v52 = vmul.f32 %v2752_v9, %v2902_v3 }
 0x153   : > { %v1375_v50 = vpack.c.bf16 %v1363_v48, %v1362_v44  ;;  %v1107_v6 = vadd.f32 %v1091_v36, %v1050_v38  ;;  %v1108_v32 = vadd.f32 %v1092_v56, %v1051_v8  ;;  %v962_v42 = vmul.f32 %v2516_v24, %v2860_v31 }
 0x154   : > { %v963_v47 = vmul.f32 %v2516_v24, %v2868_v60  ;;  %v999_v39 = vmul.f32 %v2521_v25, %v2912_v61  ;;  %v1296_v53 = vmul.f32 %v2762_v54, %v2948_v40  ;;  %v1000_v35 = vmul.f32 %v2521_v25, %v2914_v20 }
 0x155   : > { %2110 = vmatmul.mubr.bf16.gmra.mrb[4].mxu1 %v1375_v50  ;;  %v1144_v26 = vadd.f32 %v1128_v14, %v1107_v6  ;;  %v1145_v34 = vadd.f32 %v1129_v12, %v1108_v32  ;;  %v1297_v46 = vmul.f32 %v2762_v54, %v2954_v13  ;;  %v978_v31 = vadd.f32 %v962_v42, %v2451_v62  ;;  %v943_v42 = vld [vmem:[#allocation2 + $0xc0] sm:$0xff] }
 0x156   : > { %v979_v27 = vadd.f32 %v963_v47, %v2451_v62  ;;  %v1036_v60 = vmul.f32 %v2610_v21, %v2958_v1  ;;  %v1037_v37 = vmul.f32 %v2610_v21, %v2962_v5  ;;  %v1093_v57 = vmul.f32 %v2456_v63, %v2604_v18  ;;  %v3008_v47 = vld [vmem:[#allocation2 + $0xc8] sm:$0xff] }
 0x157   : > { %v1181_v29 = vadd.f32 %v1165_v23, %v1144_v26  ;;  %v1182_v59 = vadd.f32 %v1166_v43, %v1145_v34  ;;  %v1015_v30 = vadd.f32 %v999_v39, %v978_v31  ;;  %v1094_v56 = vmul.f32 %v2456_v63, %v2629_v33 }
 0x158   : > { %v1016_v36 = vadd.f32 %v1000_v35, %v979_v27  ;;  %v1130_v41 = vmul.f32 %v2461_v0, %v2694_v28  ;;  %v1131_v12 = vmul.f32 %v2461_v0, %v2709_v15  ;;  %v1167_v17 = vmul.f32 %v2615_v22, %v2688_v4  ;;  %v3015_v35 = vld [vmem:[#allocation2 + $0xaa] sm:$0xff] }
 0x159   : > { %v1238_v11 = vadd.f32 %v1222_v45, %v1181_v29  ;;  %v1239_v14 = vadd.f32 %v1223_v16, %v1182_v59  ;;  %v1052_v51 = vadd.f32 %v1036_v60, %v1015_v30  ;;  %v1168_v18 = vmul.f32 %v2615_v22, %v2701_v49 }
 0x15a   : > { %v1053_v38 = vadd.f32 %v1037_v37, %v1016_v36  ;;  %v1224_v8 = vmul.f32 %v2684_v19, %v2900_v7  ;;  %v1225_v43 = vmul.f32 %v2684_v19, %v2902_v3  ;;  %v1261_v44 = vmul.f32 %v2752_v9, %v2948_v40 }
 0x15b   : > { %v1275_v33 = vadd.f32 %v1259_v2, %v1238_v11  ;;  %v1276_v23 = vadd.f32 %v1260_v52, %v1239_v14  ;;  %v1109_v48 = vadd.f32 %v1093_v57, %v1052_v51  ;;  %v1262_v16 = vmul.f32 %v2752_v9, %v2954_v13 }
 0x15c   : > { %v1110_v45 = vadd.f32 %v1094_v56, %v1053_v38  ;;  %v964_v50 = vmul.f32 %v2516_v24, %v2912_v61  ;;  %v965_v7 = vmul.f32 %v2516_v24, %v2914_v20  ;;  %v1001_v2 = vmul.f32 %v2521_v25, %v2958_v1 }
 0x15d   : > { %v1312_v6 = vadd.f32 %v1296_v53, %v1275_v33  ;;  %v1313_v32 = vadd.f32 %v1297_v46, %v1276_v23  ;;  %v1146_v3 = vadd.f32 %v1130_v41, %v1109_v48  ;;  %v1002_v26 = vmul.f32 %v2521_v25, %v2962_v5  ;;  %v3017_v46 = vld [vmem:[#allocation2 + $0xb2] sm:$0xff] }
 0x15e   : > { %v1147_v52 = vadd.f32 %v1131_v12, %v1110_v45  ;;  %v980_v39 = vadd.f32 %v964_v50, %v2451_v62  ;;  %v981_v31 = vadd.f32 %v965_v7, %v2451_v62  ;;  %v1038_v59 = vmul.f32 %v2610_v21, %v943_v42 }
 0x15f   : > { %vm1328_vm6 = vcmp.ge.f32.partialorder %v1312_v6, 0.0  ;;  %vm1329_vm7 = vcmp.ge.f32.partialorder %v1313_v32, 0.0  ;;  %v1348_v61 = vmul.f32 %v2478_v10, %v1312_v6  ;;  %v1349_v34 = vmul.f32 %v2478_v10, %v1313_v32 }
 0x160   : > { %v1183_v20 = vadd.f32 %v1167_v17, %v1146_v3  ;;  %v1184_v53 = vadd.f32 %v1168_v18, %v1147_v52  ;;  %v1017_v27 = vadd.f32 %v1001_v2, %v980_v39  ;;  %v1039_v37 = vmul.f32 %v2610_v21, %v3008_v47  ;;  %v1205_v3 = vld [vmem:[#allocation2 + $0xc2] sm:$0xff] }
 0x161   : > { %v1364_v60 = vsel %vm1328_vm6, %v1312_v6, %v1348_v61  ;;  %v1365_v29 = vsel %vm1329_vm7, %v1313_v32, %v1349_v34  ;;  %v1018_v56 = vadd.f32 %v1002_v26, %v981_v31  ;;  %v1298_v41 = vmul.f32 %v2762_v54, %v3015_v35  ;;  %v945_v61 = vld [vmem:[#allocation2 + $0xd8] sm:$0xff]  ;;  %v1206_v31 = vld [vmem:[#allocation2 + $0xca] sm:$0xff] }
 0x162   : > { %v1376_v57 = vpack.c.bf16 %v1365_v29, %v1364_v60  ;;  %v1240_v30 = vadd.f32 %v1224_v8, %v1183_v20  ;;  %v1241_v36 = vadd.f32 %v1225_v43, %v1184_v53  ;;  %v1299_v11 = vmul.f32 %v2762_v54, %v3017_v46  ;;  %v946_v60 = vld [vmem:[#allocation2 + $0xe0] sm:$0xff] }
 0x163   : > { %v1054_v14 = vadd.f32 %v1038_v59, %v1017_v27  ;;  %v1095_v12 = vmul.f32 %v2456_v63, %v2694_v28  ;;  %v1055_v38 = vadd.f32 %v1039_v37, %v1018_v56  ;;  %v1096_v18 = vmul.f32 %v2456_v63, %v2709_v15 }
 0x164   : > { %2113 = vmatprep.mubr.bf16.mxu1 %v1376_v57  ;;  %v1277_v17 = vadd.f32 %v1261_v44, %v1240_v30  ;;  %v1278_v51 = vadd.f32 %v1262_v16, %v1241_v36  ;;  %v1132_v33 = vmul.f32 %v2461_v0, %v2688_v4  ;;  %v1133_v23 = vmul.f32 %v2461_v0, %v2701_v49 }
 0x165   : > { %v1111_v8 = vadd.f32 %v1095_v12, %v1054_v14  ;;  %v1112_v45 = vadd.f32 %v1096_v18, %v1055_v38  ;;  %v1169_v28 = vmul.f32 %v2615_v22, %v2767_v55  ;;  %v1170_v44 = vmul.f32 %v2615_v22, %v2783_v58 }
 0x166   : > { %v1314_v43 = vadd.f32 %v1298_v41, %v1277_v17  ;;  %v1315_v48 = vadd.f32 %v1299_v11, %v1278_v51  ;;  %v1226_v15 = vmul.f32 %v2684_v19, %v2948_v40  ;;  %v1227_v16 = vmul.f32 %v2684_v19, %v2954_v13 }
 0x167   : > { %v1148_v50 = vadd.f32 %v1132_v33, %v1111_v8  ;;  %v1149_v7 = vadd.f32 %v1133_v23, %v1112_v45  ;;  %v1263_v52 = vmul.f32 %v2752_v9, %v3015_v35  ;;  %v966_v39 = vmul.f32 %v2516_v24, %v2958_v1  ;;  %v3179_v23 = vld [vmem:[#allocation3_spill] sm:$0xff] }
 0x168   : > { %vm1330_vm10 = vcmp.ge.f32.partialorder %v1314_v43, 0.0  ;;  %vm1331_vm11 = vcmp.ge.f32.partialorder %v1315_v48, 0.0  ;;  %v1350_v6 = vmul.f32 %v2478_v10, %v1314_v43  ;;  %v1351_v32 = vmul.f32 %v2478_v10, %v1315_v48 }
 0x169   : > { %v1185_v2 = vadd.f32 %v1169_v28, %v1148_v50  ;;  %v967_v13 = vmul.f32 %v2516_v24, %v2962_v5  ;;  %v1003_v34 = vmul.f32 %v2521_v25, %v943_v42  ;;  %v1186_v53 = vadd.f32 %v1170_v44, %v1149_v7 }
 0x16a   : > { %v1366_v26 = vsel %vm1330_vm10, %v1314_v43, %v1350_v6  ;;  %v1367_v40 = vsel %vm1331_vm11, %v1315_v48, %v1351_v32  ;;  %v982_v29 = vadd.f32 %v966_v39, %v2451_v62  ;;  %v1264_v59 = vmul.f32 %v2752_v9, %v3017_v46 }
 0x16b   : > { %v1377_v20 = vpack.c.bf16 %v1367_v40, %v1366_v26  ;;  %v1242_v27 = vadd.f32 %v1226_v15, %v1185_v2  ;;  %v1300_v1 = vmul.f32 %v2762_v54, %v1205_v3  ;;  %v983_v37 = vadd.f32 %v967_v13, %v2451_v62 }
 0x16c   : > { %v1004_v57 = vmul.f32 %v2521_v25, %v3008_v47  ;;  %v1243_v24 = vadd.f32 %v1227_v16, %v1186_v53  ;;  %v1019_v42 = vadd.f32 %v1003_v34, %v982_v29  ;;  %v1040_v30 = vmul.f32 %v2610_v21, %v945_v61  ;;  %v1208_v16 = vld [vmem:[#allocation2 + $0xe2] sm:$0xff] }
 0x16d   : > { %2114 = vmatmul.mubr.bf16.gmra.mrb[8].mxu1 %v1377_v20  ;;  %v1279_v5 = vadd.f32 %v1263_v52, %v1242_v27  ;;  %v1301_v36 = vmul.f32 %v2762_v54, %v1206_v31  ;;  %v1041_v41 = vmul.f32 %v2610_v21, %v946_v60  ;;  %v1097_v62 = vmul.f32 %v2456_v63, %v2688_v4  ;;  %v2005_v34 = vld [vmem:[%s2354_s12 + $0x8] sm:$0xff]  }
 0x16e   : > { %v1020_v56 = vadd.f32 %v1004_v57, %v983_v37  ;;  %v1280_v11 = vadd.f32 %v1264_v59, %v1243_v24  ;;  %v1056_v12 = vadd.f32 %v1040_v30, %v1019_v42  ;;  %v1098_v25 = vmul.f32 %v2456_v63, %v2701_v49  ;;  %v3180_v49 = vld [vmem:[#allocation4_spill] sm:$0xff] }
 0x16f   : > { %v1316_v14 = vadd.f32 %v1300_v1, %v1279_v5  ;;  %v1134_v18 = vmul.f32 %v2461_v0, %v2767_v55  ;;  %v1135_v21 = vmul.f32 %v2461_v0, %v2783_v58  ;;  %v1171_v43 = vmul.f32 %v2615_v22, %v3179_v23  ;;  %v1207_v0 = vld [vmem:[#allocation2 + $0xda] sm:$0xff] }
 0x170   : > { %v1057_v17 = vadd.f32 %v1041_v41, %v1020_v56  ;;  %v1317_v47 = vadd.f32 %v1301_v36, %v1280_v11  ;;  %v1113_v38 = vadd.f32 %v1097_v62, %v1056_v12  ;;  %v1172_v48 = vmul.f32 %v2615_v22, %v3180_v49  ;;  %v2007_v11 = vld [vmem:[%s2354_s12 + $0x18] sm:$0xff]  }
 0x171   : > { %v1352_v51 = vmul.f32 %v2478_v10, %v1316_v14  ;;  %vm1332_vm2 = vcmp.ge.f32.partialorder %v1316_v14, 0.0  ;;  %v1228_v55 = vmul.f32 %v2684_v19, %v3015_v35  ;;  %v1229_v58 = vmul.f32 %v2684_v19, %v3017_v46 }
 0x172   : > { %v1114_v8 = vadd.f32 %v1098_v25, %v1057_v17  ;;  %vm1333_vm3 = vcmp.ge.f32.partialorder %v1317_v47, 0.0  ;;  %v1353_v33 = vmul.f32 %v2478_v10, %v1317_v47  ;;  %v1150_v4 = vadd.f32 %v1134_v18, %v1113_v38 }
 0x173   : > { %v1368_v45 = vsel %vm1332_vm2, %v1316_v14, %v1352_v51  ;;  %v1265_v32 = vmul.f32 %v2752_v9, %v1205_v3  ;;  %v1266_v22 = vmul.f32 %v2752_v9, %v1206_v31  ;;  %v1302_v52 = vmul.f32 %v2762_v54, %v1207_v0  ;;  %v3089_v9 = vld [vmem:[%s3152_s7] ss:$0 sm:$0xff]  ;;  %v2006_v14 = vld [vmem:[%s2354_s12 + $0x10] sm:$0xff]  }
 0x174   : > { %v1151_v63 = vadd.f32 %v1135_v21, %v1114_v8  ;;  %v1369_v28 = vsel %vm1333_vm3, %v1317_v47, %v1353_v33  ;;  %v1187_v50 = vadd.f32 %v1171_v43, %v1150_v4  ;;  %v1303_v39 = vmul.f32 %v2762_v54, %v1208_v16  ;;  %v1934_v54 = vld [vmem:[%s2354_s12] sm:$0xff]  }
 0x175   : > { %v1378_v44 = vpack.c.bf16 %v1369_v28, %v1368_v45  ;;  %v1939_v31 = vunpack.c.l.bf16 %v2005_v34  ;;  %v1940_v60 = vunpack.c.h.bf16 %v2005_v34  ;;  %v1935_v29 = vunpack.c.l.bf16 %v1934_v54  ;;  %v2009_v28 = vld [vmem:[%s2354_s12 + $0x28] sm:$0xff]  }
 0x176   : > { %v1188_v15 = vadd.f32 %v1172_v48, %v1151_v63  ;;  %v1244_v6 = vadd.f32 %v1228_v55, %v1187_v50  ;;  %v1936_v1 = vunpack.c.h.bf16 %v1934_v54  ;;  %v1947_v17 = vunpack.c.l.bf16 %v2007_v11  ;;  %v2008_v50 = vld [vmem:[%s2354_s12 + $0x20] sm:$0xff]  }
 0x177   : > { %2117 = vmatprep.mubr.bf16.mxu1 %v1378_v44  ;;  %v1948_v47 = vunpack.c.h.bf16 %v2007_v11  ;;  %v1943_v38 = vunpack.c.l.bf16 %v2006_v14  ;;  %v1944_v8 = vunpack.c.h.bf16 %v2006_v14 }
 0x178   : > { %v1245_v7 = vadd.f32 %v1229_v58, %v1188_v15  ;;  %v1281_v2 = vadd.f32 %v1265_v32, %v1244_v6  ;;  %v1955_v15 = vunpack.c.l.bf16 %v2009_v28  ;;  %v1956_v58 = vunpack.c.h.bf16 %v2009_v28 }
 0x179   : > { %v1951_v6 = vunpack.c.l.bf16 %v2008_v50 }
 0x17a   : > { %v1282_v35 = vadd.f32 %v1266_v22, %v1245_v7  ;;  %v1318_v26 = vadd.f32 %v1302_v52, %v1281_v2  ;;  %v1952_v7 = vunpack.c.h.bf16 %v2008_v50 }
 0x17c   : > { %v1319_v40 = vadd.f32 %v1303_v39, %v1282_v35  ;;  %vm1334_vm14 = vcmp.ge.f32.partialorder %v1318_v26, 0.0  ;;  %v1354_v19 = vmul.f32 %v2478_v10, %v1318_v26 }
 0x17e   : > { %vm1335_vm15 = vcmp.ge.f32.partialorder %v1319_v40, 0.0  ;;  %v1355_v46 = vmul.f32 %v2478_v10, %v1319_v40  ;;  %v1370_v3 = vsel %vm1334_vm14, %v1318_v26, %v1354_v19 }
 0x180   : > { %v1371_v61 = vsel %vm1335_vm15, %v1319_v40, %v1355_v46 }
 0x181   : > { %v1379_v13 = vpack.c.bf16 %v1371_v61, %v1370_v3  ;;  %v2011_v3 = vld [vmem:[%s2354_s12 + $0x38] sm:$0xff]   ;;  %v2010_v61 = vld [vmem:[%s2354_s12 + $0x30] sm:$0xff]  }
 0x182   : > { %v1963_v54 = vunpack.c.l.bf16 %v2011_v3 }
 0x183   : > { %2118 = vmatmul.mubr.bf16.gmra.mrb[12].mxu1 %v1379_v13 }
 0x21a   : > { %v2107_v20 = vpop.f32.mrb[0].mxu1 }
 0x21b   : > { %v1494_v53 = vadd.f32 %v2107_v20, %v3089_v9  ;;  %v1485_v27 = vpop.f32.mrb[1].mxu1 }
 0x21c   : > { %v1486_v10 = vadd.f32 %v3089_v9, %v1485_v27  ;;  %v2108_v59 = vpop.f32.mrb[2].mxu1  ;;  %v1959_v27 = vunpack.c.l.bf16 %v2010_v61 }
 0x21d   : > { %v1497_v37 = vadd.f32 %v2108_v59, %v3089_v9  ;;  %v1488_v57 = vpop.f32.mrb[3].mxu1  ;;  %v1582_v5 = vadd.f32 %v1939_v31, %v1494_v53  ;;  %v1964_v53 = vunpack.c.h.bf16 %v2011_v3 }
 0x21e   : > { %v1489_v24 = vadd.f32 %v3089_v9, %v1488_v57  ;;  %v1580_v30 = vadd.f32 %v1935_v29, %v1486_v10  ;;  %v1960_v10 = vunpack.c.h.bf16 %v2010_v61 }
 0x21f   : > { %v1583_v42 = vadd.f32 %v1940_v60, %v1497_v37 }
 0x220   : > { %v1581_v36 = vadd.f32 %v1936_v1, %v1489_v24 }
 0x221   : > { %v1973_v56 = vpack.c.bf16 %v1583_v42, %v1582_v5 }
 0x222   : > { %v1968_v41 = vpack.c.bf16 %v1581_v36, %v1580_v30 }
 0x223   : > { %2012 = vst [vmem:[%s3102_s26 + $0x8] sm:$0xff] %v1973_v56  }
 0x224   : > { %1969 = vst [vmem:[%s3102_s26] sm:$0xff] %v1968_v41  }
 0x228   : > { %v2111_v12 = vpop.f32.mrb[4].mxu1 }
 0x229   : > { %v1510_v62 = vadd.f32 %v2111_v12, %v3089_v9  ;;  %v1501_v25 = vpop.f32.mrb[5].mxu1 }
 0x22a   : > { %v1502_v51 = vadd.f32 %v3089_v9, %v1501_v25  ;;  %v2112_v18 = vpop.f32.mrb[6].mxu1 }
 0x22b   : > { %v1513_v21 = vadd.f32 %v2112_v18, %v3089_v9  ;;  %v1504_v33 = vpop.f32.mrb[7].mxu1  ;;  %v1586_v23 = vadd.f32 %v1947_v17, %v1510_v62 }
 0x22c   : > { %v1505_v4 = vadd.f32 %v3089_v9, %v1504_v33  ;;  %v1584_v63 = vadd.f32 %v1943_v38, %v1502_v51 }
 0x22d   : > { %v1587_v43 = vadd.f32 %v1948_v47, %v1513_v21 }
 0x22e   : > { %v1585_v49 = vadd.f32 %v1944_v8, %v1505_v4 }
 0x22f   : > { %v1983_v48 = vpack.c.bf16 %v1587_v43, %v1586_v23 }
 0x230   : > { %v1978_v45 = vpack.c.bf16 %v1585_v49, %v1584_v63 }
 0x231   : > { %2014 = vst [vmem:[%s3102_s26 + $0x18] sm:$0xff] %v1983_v48  }
 0x232   : > { %2013 = vst [vmem:[%s3102_s26 + $0x10] sm:$0xff] %v1978_v45  }
 0x240   : > { %v2115_v55 = vpop.f32.mrb[8].mxu1 }
 0x241   : > { %v1526_v44 = vadd.f32 %v2115_v55, %v3089_v9  ;;  %v1517_v0 = vpop.f32.mrb[9].mxu1 }
 0x242   : > { %v1518_v16 = vadd.f32 %v3089_v9, %v1517_v0  ;;  %v2116_v32 = vpop.f32.mrb[10].mxu1 }
 0x243   : > { %v1529_v22 = vadd.f32 %v2116_v32, %v3089_v9  ;;  %v1520_v2 = vpop.f32.mrb[11].mxu1  ;;  %v1590_v35 = vadd.f32 %v1955_v15, %v1526_v44 }
 0x244   : > { %v1521_v52 = vadd.f32 %v3089_v9, %v1520_v2  ;;  %v1588_v26 = vadd.f32 %v1951_v6, %v1518_v16 }
 0x245   : > { %v1591_v39 = vadd.f32 %v1956_v58, %v1529_v22 }
 0x246   : > { %v1589_v40 = vadd.f32 %v1952_v7, %v1521_v52 }
 0x247   : > { %v1993_v19 = vpack.c.bf16 %v1591_v39, %v1590_v35 }
 0x248   : > { %v1988_v46 = vpack.c.bf16 %v1589_v40, %v1588_v26 }
 0x249   : > { %2016 = vst [vmem:[%s3102_s26 + $0x28] sm:$0xff] %v1993_v19  }
 0x24a   : > { %2015 = vst [vmem:[%s3102_s26 + $0x20] sm:$0xff] %v1988_v46  }
 0x256   : > { %v2119_v13 = vpop.f32.mrb[12].mxu1 }
 0x257   : > { %v1542_v34 = vadd.f32 %v2119_v13, %v3089_v9  ;;  %v1533_v20 = vpop.f32.mrb[13].mxu1 }
 0x258   : > { %v1534_v31 = vadd.f32 %v3089_v9, %v1533_v20  ;;  %v2120_v60 = vpop.f32.mrb[14].mxu1 }
 0x259   : > { %v1545_v29 = vadd.f32 %v2120_v60, %v3089_v9  ;;  %v1536_v59 = vpop.f32.mrb[15].mxu1  ;;  %v1594_v37 = vadd.f32 %v1963_v54, %v1542_v34 }
 0x25a   : > { %v1537_v1 = vadd.f32 %v3089_v9, %v1536_v59  ;;  %v1592_v24 = vadd.f32 %v1959_v27, %v1534_v31 }
 0x25b   : > { %v1595_v57 = vadd.f32 %v1964_v53, %v1545_v29 }
 0x25c   : > { %v1593_v5 = vadd.f32 %v1960_v10, %v1537_v1 }
 0x25d   : > { %v2003_v42 = vpack.c.bf16 %v1595_v57, %v1594_v37 }
 0x25e   : > { %v1998_v30 = vpack.c.bf16 %v1593_v5, %v1592_v24 }
 0x25f   : > { %2018 = vst [vmem:[%s3102_s26 + $0x38] sm:$0xff] %v2003_v42  }
 0x260   : > { %2017 = vst [vmem:[%s3102_s26 + $0x30] sm:$0xff] %v1998_v30  }
 0x261 PF: > { %s18_s9 = sadd.s32 1, %s2226_s9   ;;  %s3181_s27 = smov %s2218_s29 }
 0x262   : > { %p15_p10 = scmp.ge.s32.totalorder %s18_s9, 6   ;;  %s3182_s28 = smov %s2222_s30 }
 0x263   : > { %s3183_s29 = smov %s3186_s10  ;;  %s3184_s30 = smov %s3190_s11 }
 0x264   :  { %17 = sbr.rel (!%p15_p10) target bundleno = 3 (0x3), region = 88 }

</bundles_post_ra>
